<compile_context>
chip_gen: v5e
topology: v5e:2x2
jax: 0.10.0
libtpu: 0.0.40
codegen_flags: <defaults>
</compile_context>

<pallas_src>
import functools

import jax
import jax.numpy as jnp
from jax.experimental import pallas as pl
from jax.experimental.pallas import tpu as pltpu


def _round_up(x, m):
    return (x + m - 1) // m * m


# ----------------------------- Pallas kernels ------------------------------

def _gemm_bias_act_noacc_kernel(a_ref, b_ref, bias_ref, o_ref, *, relu):
    """Single-K-block GEMM: no scratch accumulator needed; bias+ReLU fused."""
    y = jnp.dot(a_ref[...], b_ref[...], preferred_element_type=jnp.float32)
    y = y + bias_ref[...]
    if relu:
        y = jnp.maximum(y, 0.0)
    o_ref[...] = y.astype(o_ref.dtype)


def _gemm_bias_act_acc_kernel(a_ref, b_ref, bias_ref, o_ref, acc_ref, *, relu):
    """Generic K-tiled GEMM fallback: f32 accumulator, pl.when init/finalize."""
    k = pl.program_id(2)

    @pl.when(k == 0)
    def _():
        acc_ref[...] = jnp.zeros_like(acc_ref)

    acc_ref[...] += jnp.dot(a_ref[...], b_ref[...],
                            preferred_element_type=jnp.float32)

    @pl.when(k == pl.num_programs(2) - 1)
    def _():
        y = acc_ref[...] + bias_ref[...]
        if relu:
            y = jnp.maximum(y, 0.0)
        o_ref[...] = y.astype(o_ref.dtype)


def pallas_gemm_bias_act(a, b, bias, *, relu,
                         m_full_max=4096, n_full_max=2048, k_full_max=4096,
                         m_split_threshold=512):
    """out = act(a @ b + bias).  a:(M,K) f32, b:(K,N) f32, bias:(1,N) f32.

    Block policy (per perf review): full-extent blocks whenever they fit —
    these GEMMs are launch/grid-step bound, not MXU bound — with a 2-way M
    split (no padding) for larger M so dimension_semantics="parallel" can
    feed both v7x TensorCores.  Tiled+padded path is only a large-shape
    fallback and is unused by SimpleConv.
    """
    M, K = a.shape
    K2, N = b.shape
    assert K == K2 and bias.shape == (1, N)

    # ---- M blocks: 2 parallel blocks when big enough (M%16==0 keeps the
    # block sublane-aligned), else full extent; pad+tile only for huge M.
    if m_split_threshold <= M <= 2 * m_full_max and M % 16 == 0:
        tm, Mp = M // 2, M
    elif M <= m_full_max:
        tm, Mp = M, M
    else:
        tm, Mp = 512, _round_up(M, 512)

    # ---- N / K: full extent (always layout-legal) unless genuinely huge.
    if N <= n_full_max:
        tn, Np = N, N
    else:
        tn, Np = 256, _round_up(N, 256)
    if K <= k_full_max:
        tk, Kp = K, K
    else:
        tk, Kp = 512, _round_up(K, 512)

    a = a.astype(jnp.float32)
    b = b.astype(jnp.float32)
    bias = bias.astype(jnp.float32)
    a_p = a if (Mp == M and Kp == K) else jnp.pad(a, ((0, Mp - M), (0, Kp - K)))
    b_p = b if (Kp == K and Np == N) else jnp.pad(b, ((0, Kp - K), (0, Np - N)))
    bias_p = bias if Np == N else jnp.pad(bias, ((0, 0), (0, Np - N)))

    nm, nn, nk = Mp // tm, Np // tn, Kp // tk

    if nk == 1:
        kernel = functools.partial(_gemm_bias_act_noacc_kernel, relu=relu)
        scratch = []
    else:
        kernel = functools.partial(_gemm_bias_act_acc_kernel, relu=relu)
        scratch = [pltpu.VMEM((tm, tn), jnp.float32)]

    cost = pl.CostEstimate(
        flops=2 * Mp * Np * Kp,
        transcendentals=0,
        bytes_accessed=4 * (Mp * Kp + Kp * Np + Mp * Np + Np))

    out = pl.pallas_call(
        kernel,
        out_shape=jax.ShapeDtypeStruct((Mp, Np), jnp.float32),
        grid=(nm, nn, nk),
        in_specs=[pl.BlockSpec((tm, tk), lambda i, j, k: (i, k)),
                  pl.BlockSpec((tk, tn), lambda i, j, k: (k, j)),
                  pl.BlockSpec((1, tn), lambda i, j, k: (0, j))],
        out_specs=pl.BlockSpec((tm, tn), lambda i, j, k: (i, j)),
        scratch_shapes=scratch,
        compiler_params=pltpu.CompilerParams(
            dimension_semantics=("parallel", "parallel", "arbitrary")),
        cost_estimate=cost,
    )(a_p, b_p, bias_p)

    if Mp != M or Np != N:
        out = out[:M, :N]
    return out


def _fc_head_kernel(x_ref, w1_ref, b1_ref, w2_ref, b2_ref, o_ref):
    """fc1 (bias + ReLU) and fc2 fused: the (M,128) fc1 activation stays in VMEM."""
    h = jnp.dot(x_ref[...], w1_ref[...], preferred_element_type=jnp.float32)
    h = jnp.maximum(h + b1_ref[...], 0.0)
    y = jnp.dot(h, w2_ref[...], preferred_element_type=jnp.float32) + b2_ref[...]
    o_ref[...] = y.astype(o_ref.dtype)


def pallas_fc_head(x, w1, b1, w2, b2):
    """out = (relu(x @ w1 + b1)) @ w2 + b2 in ONE pallas_call, full-extent blocks.

    K = 1600 is NOT tiled (w1 block is 819 KB: fits double-buffered even under
    v7x's 32 MiB default scoped VMEM limit), removing the 2048-pad and the
    accumulator revisits of the previous version, and one kernel launch plus
    an HBM round trip for the 1 KB fc1 activation disappear.
    """
    M, K = x.shape
    K1, H = w1.shape
    H2, N = w2.shape
    assert K1 == K and H2 == H and b1.shape == (1, H) and b2.shape == (1, N)

    return pl.pallas_call(
        _fc_head_kernel,
        out_shape=jax.ShapeDtypeStruct((M, N), jnp.float32),
        grid=(1,),
        in_specs=[pl.BlockSpec((M, K), lambda i: (0, 0)),
                  pl.BlockSpec((K, H), lambda i: (0, 0)),
                  pl.BlockSpec((1, H), lambda i: (0, 0)),
                  pl.BlockSpec((H, N), lambda i: (0, 0)),
                  pl.BlockSpec((1, N), lambda i: (0, 0))],
        out_specs=pl.BlockSpec((M, N), lambda i: (0, 0)),
        compiler_params=pltpu.CompilerParams(dimension_semantics=("arbitrary",)),
    )(x.astype(jnp.float32), w1.astype(jnp.float32), b1.astype(jnp.float32),
      w2.astype(jnp.float32), b2.astype(jnp.float32))


# -------------------------------- JAX glue ---------------------------------

def _im2col_valid(x_nhwc, kh, kw):
    """'valid' (no padding), stride-1 patch extraction -> (N*Ho*Wo, kh*kw*C).

    Column order is (kh, kw, cin), matching the stored weight layout.
    """
    N, H, W, C = x_nhwc.shape
    Ho, Wo = H - kh + 1, W - kw + 1
    cols = []
    for i in range(kh):
        for j in range(kw):
            cols.append(x_nhwc[:, i:i + Ho, j:j + Wo, :])
    patches = jnp.concatenate(cols, axis=-1)            # (N, Ho, Wo, kh*kw*C)
    return patches.reshape(N * Ho * Wo, kh * kw * C), Ho, Wo


def maxpool2x2(x_nhwc):
    """MaxPool2d(kernel=2, stride=2), NHWC, as plain jnp.

    Per the perf review: at <150 KB this pool is pure launch/DMA overhead as a
    standalone Pallas kernel (and its four strided-corner slices doubled HBM
    traffic), so we let XLA fuse the free reshape + 4-way max with the
    adjacent im2col / transpose instead.
    TODO(synk): at large batch, fold this 4-way max into the conv GEMM epilogue.
    """
    N, H, W, C = x_nhwc.shape
    Ho, Wo = H // 2, W // 2
    x = x_nhwc[:, :2 * Ho, :2 * Wo, :].reshape(N, Ho, 2, Wo, 2, C)
    return jnp.max(x, axis=(2, 4))


def init_simpleconv_params(key):
    """Kaiming-normal weights + uniform(-1/sqrt(fan_in)) biases, as in _weights_init.

    Conv weights are stored directly in im2col GEMM layout (kh*kw*cin, cout);
    linear weights in (in, out) layout.  (PyTorch import needs
    w.permute(2, 3, 1, 0).reshape(kh*kw*cin, cout) for the convs.)
    """
    ks = jax.random.split(key, 8)

    def kaiming(k, shape, fan_in):
        return jax.random.normal(k, shape, jnp.float32) * jnp.sqrt(2.0 / fan_in)

    def bias(k, n, fan_in):
        bound = 1.0 / jnp.sqrt(float(fan_in))
        return jax.random.uniform(k, (1, n), jnp.float32, -bound, bound)

    return {
        # conv1: 5x5, 1 -> 32
        "w1": kaiming(ks[0], (5 * 5 * 1, 32), 5 * 5 * 1),
        "b1": bias(ks[1], 32, 5 * 5 * 1),
        # conv2: 3x3, 32 -> 64
        "w2": kaiming(ks[2], (3 * 3 * 32, 64), 3 * 3 * 32),
        "b2": bias(ks[3], 64, 3 * 3 * 32),
        # fc1: 1600 -> 128
        "wf1": kaiming(ks[4], (64 * 5 * 5, 128), 64 * 5 * 5),
        "bf1": bias(ks[5], 128, 64 * 5 * 5),
        # fc2: 128 -> 10
        "wf2": kaiming(ks[6], (128, 10), 128),
        "bf2": bias(ks[7], 10, 128),
    }


def simpleconv_forward(x_nchw, params):
    # Note (perf review): the real throughput lever at these shapes is batching
    # more images per call — M scales as batch*576 for conv1 and the full-extent
    # / 2-way-split block policy above scales with it automatically.
    x = jnp.transpose(x_nchw, (0, 2, 3, 1)).astype(jnp.float32)   # NCHW -> NHWC
    N = x.shape[0]

    # conv1 (5x5, valid) + bias + ReLU  -> maxpool 2x2
    p1, h1, w1 = _im2col_valid(x, 5, 5)                           # (N*24*24, 25)
    y = pallas_gemm_bias_act(p1, params["w1"], params["b1"], relu=True)
    y = maxpool2x2(y.reshape(N, h1, w1, 32))                      # (N, 12, 12, 32)

    # conv2 (3x3, valid) + bias + ReLU  -> maxpool 2x2
    p2, h2, w2 = _im2col_valid(y, 3, 3)                           # (N*10*10, 288)
    y = pallas_gemm_bias_act(p2, params["w2"], params["b2"], relu=True)
    y = maxpool2x2(y.reshape(N, h2, w2, 64))                      # (N, 5, 5, 64)

    # flatten in NCHW order to match torch's x.view(N, -1)
    y = jnp.transpose(y, (0, 3, 1, 2)).reshape(N, 64 * 5 * 5)

    # fc1 + ReLU and fc2, fused into one Pallas kernel
    return pallas_fc_head(y, params["wf1"], params["bf1"],
                          params["wf2"], params["bf2"])            # (N, 10)


def _reference_forward(x_nchw, params):
    """Pure-jnp f32 reference (HIGHEST precision matmuls) for a sanity check."""
    x = jnp.transpose(x_nchw, (0, 2, 3, 1)).astype(jnp.float32)
    N = x.shape[0]

    def dense(a, w, b, relu):
        y = jnp.dot(a, w, precision=jax.lax.Precision.HIGHEST) + b
        return jnp.maximum(y, 0.0) if relu else y

    p1, h1, w1 = _im2col_valid(x, 5, 5)
    y = maxpool2x2(dense(p1, params["w1"], params["b1"], True).reshape(N, h1, w1, 32))
    p2, h2, w2 = _im2col_valid(y, 3, 3)
    y = maxpool2x2(dense(p2, params["w2"], params["b2"], True).reshape(N, h2, w2, 64))
    y = jnp.transpose(y, (0, 3, 1, 2)).reshape(N, -1)
    y = dense(y, params["wf1"], params["bf1"], True)
    return dense(y, params["wf2"], params["bf2"], False)


if __name__ == "__main__":
    key = jax.random.PRNGKey(0)
    kx, kp = jax.random.split(key)

    # Input implied by fc1 = Linear(64*5*5, 128): 1x28x28 (MNIST-like), batch 2.
    x = jax.random.normal(kx, (2, 1, 28, 28), jnp.float32)
    params = init_simpleconv_params(kp)

    fwd = jax.jit(simpleconv_forward)
    out = jax.block_until_ready(fwd(x, params))

    assert out.shape == (2, 10), out.shape
    assert bool(jnp.all(jnp.isfinite(out)))

    ref = jax.block_until_ready(_reference_forward(x, params))
    err = float(jnp.max(jnp.abs(out - ref)))
    tol = 1e-3 + 1e-2 * float(jnp.max(jnp.abs(ref)))
    assert err < tol, f"max abs error vs f32 reference: {err} (tol {tol})"

    print("KERNEL_OK")
</pallas_src>

<mosaic_0001>
module attributes {stable_mosaic.version = 11 : i64} {
  func.func @_gemm_bias_act_noacc_kernel(%arg0: i32, %arg1: i32, %arg2: i32, %arg3: memref<576x25xf32, #tpu.memory_space<vmem>>, %arg4: memref<25x32xf32, #tpu.memory_space<vmem>>, %arg5: memref<1x32xf32, #tpu.memory_space<vmem>>, %arg6: memref<576x32xf32, #tpu.memory_space<vmem>>) attributes {dimension_semantics = [#tpu.dimension_semantics<parallel>, #tpu.dimension_semantics<parallel>, #tpu.dimension_semantics<arbitrary>], iteration_bounds = array<i64: 2, 1, 1>, scalar_prefetch = 0 : i64, scratch_operands = 0 : i64, tpu.core_type = #tpu.core_type<tc>, window_params = [{transform_indices = @transform_0, window_bounds = array<i64: 576, 25>}, {transform_indices = @transform_1, window_bounds = array<i64: 25, 32>}, {transform_indices = @transform_2, window_bounds = array<i64: 1, 32>}, {transform_indices = @transform_3, window_bounds = array<i64: 576, 32>}]} {
    %c0 = arith.constant 0 : index
    %c0_0 = arith.constant 0 : index
    %0 = vector.load %arg3[%c0, %c0_0] : memref<576x25xf32, #tpu.memory_space<vmem>>, vector<576x25xf32>
    %c0_1 = arith.constant 0 : index
    %c0_2 = arith.constant 0 : index
    %1 = vector.load %arg4[%c0_1, %c0_2] : memref<25x32xf32, #tpu.memory_space<vmem>>, vector<25x32xf32>
    %cst = arith.constant dense<0.000000e+00> : vector<576x32xf32>
    %2 = tpu.matmul %0, %1, %cst {dimension_numbers = #tpu.dot_dimension_numbers<[1], [0], [0], [1], [0, 0, 1, 1], [], []>} : vector<576x25xf32>, vector<25x32xf32>, vector<576x32xf32> -> vector<576x32xf32>
    %c0_3 = arith.constant 0 : index
    %c0_4 = arith.constant 0 : index
    %3 = vector.load %arg5[%c0_3, %c0_4] : memref<1x32xf32, #tpu.memory_space<vmem>>, vector<1x32xf32>
    %4 = vector.broadcast %3 : vector<1x32xf32> to vector<576x32xf32>
    %5 = arith.addf %2, %4 : vector<576x32xf32>
    %cst_5 = arith.constant 0.000000e+00 : f32
    %6 = vector.broadcast %cst_5 : f32 to vector<576x32xf32>
    %7 = arith.maximumf %5, %6 : vector<576x32xf32>
    %c0_6 = arith.constant 0 : index
    %c0_7 = arith.constant 0 : index
    %8 = vector.load %arg6[%c0_6, %c0_7] : memref<576x32xf32, #tpu.memory_space<vmem>>, vector<576x32xf32>
    tpu.vector_store %arg6[%c0_6, %c0_7], %7 {strides = array<i32>} : memref<576x32xf32, #tpu.memory_space<vmem>>, vector<576x32xf32>,
    return
  }
  func.func @transform_0(%arg0: i32, %arg1: i32, %arg2: i32) -> (i32, i32) {
    %c0_i32 = arith.constant 0 : i32
    return %arg0, %arg2 : i32, i32
  }
  func.func @transform_1(%arg0: i32, %arg1: i32, %arg2: i32) -> (i32, i32) {
    %c0_i32 = arith.constant 0 : i32
    return %arg2, %arg1 : i32, i32
  }
  func.func @transform_2(%arg0: i32, %arg1: i32, %arg2: i32) -> (i32, i32) {
    %c0_i32 = arith.constant 0 : i32
    %c0_i32_0 = arith.constant 0 : i32
    return %c0_i32, %arg1 : i32, i32
  }
  func.func @transform_3(%arg0: i32, %arg1: i32, %arg2: i32) -> (i32, i32) {
    %c0_i32 = arith.constant 0 : i32
    return %arg0, %arg1 : i32, i32
  }
}

module attributes {stable_mosaic.version = 11 : i64} {
  func.func @_gemm_bias_act_noacc_kernel(%arg0: i32, %arg1: i32, %arg2: i32, %arg3: memref<200x288xf32, #tpu.memory_space<vmem>>, %arg4: memref<288x64xf32, #tpu.memory_space<vmem>>, %arg5: memref<1x64xf32, #tpu.memory_space<vmem>>, %arg6: memref<200x64xf32, #tpu.memory_space<vmem>>) attributes {dimension_semantics = [#tpu.dimension_semantics<parallel>, #tpu.dimension_semantics<parallel>, #tpu.dimension_semantics<arbitrary>], iteration_bounds = array<i64: 1, 1, 1>, scalar_prefetch = 0 : i64, scratch_operands = 0 : i64, tpu.core_type = #tpu.core_type<tc>, window_params = [{transform_indices = @transform_0, window_bounds = array<i64: 200, 288>}, {transform_indices = @transform_1, window_bounds = array<i64: 288, 64>}, {transform_indices = @transform_2, window_bounds = array<i64: 1, 64>}, {transform_indices = @transform_3, window_bounds = array<i64: 200, 64>}]} {
    %c0 = arith.constant 0 : index
    %c0_0 = arith.constant 0 : index
    %0 = vector.load %arg3[%c0, %c0_0] : memref<200x288xf32, #tpu.memory_space<vmem>>, vector<200x288xf32>
    %c0_1 = arith.constant 0 : index
    %c0_2 = arith.constant 0 : index
    %1 = vector.load %arg4[%c0_1, %c0_2] : memref<288x64xf32, #tpu.memory_space<vmem>>, vector<288x64xf32>
    %cst = arith.constant dense<0.000000e+00> : vector<200x64xf32>
    %2 = tpu.matmul %0, %1, %cst {dimension_numbers = #tpu.dot_dimension_numbers<[1], [0], [0], [1], [0, 0, 1, 1], [], []>} : vector<200x288xf32>, vector<288x64xf32>, vector<200x64xf32> -> vector<200x64xf32>
    %c0_3 = arith.constant 0 : index
    %c0_4 = arith.constant 0 : index
    %3 = vector.load %arg5[%c0_3, %c0_4] : memref<1x64xf32, #tpu.memory_space<vmem>>, vector<1x64xf32>
    %4 = vector.broadcast %3 : vector<1x64xf32> to vector<200x64xf32>
    %5 = arith.addf %2, %4 : vector<200x64xf32>
    %cst_5 = arith.constant 0.000000e+00 : f32
    %6 = vector.broadcast %cst_5 : f32 to vector<200x64xf32>
    %7 = arith.maximumf %5, %6 : vector<200x64xf32>
    %c0_6 = arith.constant 0 : index
    %c0_7 = arith.constant 0 : index
    %8 = vector.load %arg6[%c0_6, %c0_7] : memref<200x64xf32, #tpu.memory_space<vmem>>, vector<200x64xf32>
    tpu.vector_store %arg6[%c0_6, %c0_7], %7 {strides = array<i32>} : memref<200x64xf32, #tpu.memory_space<vmem>>, vector<200x64xf32>,
    return
  }
  func.func @transform_0(%arg0: i32, %arg1: i32, %arg2: i32) -> (i32, i32) {
    %c0_i32 = arith.constant 0 : i32
    return %arg0, %arg2 : i32, i32
  }
  func.func @transform_1(%arg0: i32, %arg1: i32, %arg2: i32) -> (i32, i32) {
    %c0_i32 = arith.constant 0 : i32
    return %arg2, %arg1 : i32, i32
  }
  func.func @transform_2(%arg0: i32, %arg1: i32, %arg2: i32) -> (i32, i32) {
    %c0_i32 = arith.constant 0 : i32
    %c0_i32_0 = arith.constant 0 : i32
    return %c0_i32, %arg1 : i32, i32
  }
  func.func @transform_3(%arg0: i32, %arg1: i32, %arg2: i32) -> (i32, i32) {
    %c0_i32 = arith.constant 0 : i32
    return %arg0, %arg1 : i32, i32
  }
}

module attributes {stable_mosaic.version = 11 : i64} {
  func.func @_fc_head_kernel(%arg0: i32, %arg1: memref<2x1600xf32, #tpu.memory_space<vmem>>, %arg2: memref<1600x128xf32, #tpu.memory_space<vmem>>, %arg3: memref<1x128xf32, #tpu.memory_space<vmem>>, %arg4: memref<128x10xf32, #tpu.memory_space<vmem>>, %arg5: memref<1x10xf32, #tpu.memory_space<vmem>>, %arg6: memref<2x10xf32, #tpu.memory_space<vmem>>) attributes {dimension_semantics = [#tpu.dimension_semantics<arbitrary>], iteration_bounds = array<i64: 1>, scalar_prefetch = 0 : i64, scratch_operands = 0 : i64, tpu.core_type = #tpu.core_type<tc>, window_params = [{pipeline_mode = #tpu.pipeline_mode<synchronous>, transform_indices = @transform_0, window_bounds = array<i64: 2, 1600>}, {pipeline_mode = #tpu.pipeline_mode<synchronous>, transform_indices = @transform_1, window_bounds = array<i64: 1600, 128>}, {pipeline_mode = #tpu.pipeline_mode<synchronous>, transform_indices = @transform_2, window_bounds = array<i64: 1, 128>}, {pipeline_mode = #tpu.pipeline_mode<synchronous>, transform_indices = @transform_3, window_bounds = array<i64: 128, 10>}, {pipeline_mode = #tpu.pipeline_mode<synchronous>, transform_indices = @transform_4, window_bounds = array<i64: 1, 10>}, {pipeline_mode = #tpu.pipeline_mode<synchronous>, transform_indices = @transform_5, window_bounds = array<i64: 2, 10>}]} {
    %c0 = arith.constant 0 : index
    %c0_0 = arith.constant 0 : index
    %0 = vector.load %arg1[%c0, %c0_0] : memref<2x1600xf32, #tpu.memory_space<vmem>>, vector<2x1600xf32>
    %c0_1 = arith.constant 0 : index
    %c0_2 = arith.constant 0 : index
    %1 = vector.load %arg2[%c0_1, %c0_2] : memref<1600x128xf32, #tpu.memory_space<vmem>>, vector<1600x128xf32>
    %cst = arith.constant dense<0.000000e+00> : vector<2x128xf32>
    %2 = tpu.matmul %0, %1, %cst {dimension_numbers = #tpu.dot_dimension_numbers<[1], [0], [0], [1], [0, 0, 1, 1], [], []>} : vector<2x1600xf32>, vector<1600x128xf32>, vector<2x128xf32> -> vector<2x128xf32>
    %c0_3 = arith.constant 0 : index
    %c0_4 = arith.constant 0 : index
    %3 = vector.load %arg3[%c0_3, %c0_4] : memref<1x128xf32, #tpu.memory_space<vmem>>, vector<1x128xf32>
    %4 = vector.broadcast %3 : vector<1x128xf32> to vector<2x128xf32>
    %5 = arith.addf %2, %4 : vector<2x128xf32>
    %cst_5 = arith.constant 0.000000e+00 : f32
    %6 = vector.broadcast %cst_5 : f32 to vector<2x128xf32>
    %7 = arith.maximumf %5, %6 : vector<2x128xf32>
    %c0_6 = arith.constant 0 : index
    %c0_7 = arith.constant 0 : index
    %8 = vector.load %arg4[%c0_6, %c0_7] : memref<128x10xf32, #tpu.memory_space<vmem>>, vector<128x10xf32>
    %cst_8 = arith.constant dense<0.000000e+00> : vector<2x10xf32>
    %9 = tpu.matmul %7, %8, %cst_8 {dimension_numbers = #tpu.dot_dimension_numbers<[1], [0], [0], [1], [0, 0, 1, 1], [], []>} : vector<2x128xf32>, vector<128x10xf32>, vector<2x10xf32> -> vector<2x10xf32>
    %c0_9 = arith.constant 0 : index
    %c0_10 = arith.constant 0 : index
    %10 = vector.load %arg5[%c0_9, %c0_10] : memref<1x10xf32, #tpu.memory_space<vmem>>, vector<1x10xf32>
    %11 = vector.broadcast %10 : vector<1x10xf32> to vector<2x10xf32>
    %12 = arith.addf %9, %11 : vector<2x10xf32>
    %c0_11 = arith.constant 0 : index
    %c0_12 = arith.constant 0 : index
    %13 = vector.load %arg6[%c0_11, %c0_12] : memref<2x10xf32, #tpu.memory_space<vmem>>, vector<2x10xf32>
    tpu.vector_store %arg6[%c0_11, %c0_12], %12 {strides = array<i32>} : memref<2x10xf32, #tpu.memory_space<vmem>>, vector<2x10xf32>,
    return
  }
  func.func @transform_0(%arg0: i32) -> (i32, i32) {
    %c0_i32 = arith.constant 0 : i32
    %c0_i32_0 = arith.constant 0 : i32
    %c0_i32_1 = arith.constant 0 : i32
    return %c0_i32, %c0_i32_0 : i32, i32
  }
  func.func @transform_1(%arg0: i32) -> (i32, i32) {
    %c0_i32 = arith.constant 0 : i32
    %c0_i32_0 = arith.constant 0 : i32
    %c0_i32_1 = arith.constant 0 : i32
    return %c0_i32, %c0_i32_0 : i32, i32
  }
  func.func @transform_2(%arg0: i32) -> (i32, i32) {
    %c0_i32 = arith.constant 0 : i32
    %c0_i32_0 = arith.constant 0 : i32
    %c0_i32_1 = arith.constant 0 : i32
    return %c0_i32, %c0_i32_0 : i32, i32
  }
  func.func @transform_3(%arg0: i32) -> (i32, i32) {
    %c0_i32 = arith.constant 0 : i32
    %c0_i32_0 = arith.constant 0 : i32
    %c0_i32_1 = arith.constant 0 : i32
    return %c0_i32, %c0_i32_0 : i32, i32
  }
  func.func @transform_4(%arg0: i32) -> (i32, i32) {
    %c0_i32 = arith.constant 0 : i32
    %c0_i32_0 = arith.constant 0 : i32
    %c0_i32_1 = arith.constant 0 : i32
    return %c0_i32, %c0_i32_0 : i32, i32
  }
  func.func @transform_5(%arg0: i32) -> (i32, i32) {
    %c0_i32 = arith.constant 0 : i32
    %c0_i32_0 = arith.constant 0 : i32
    %c0_i32_1 = arith.constant 0 : i32
    return %c0_i32, %c0_i32_0 : i32, i32
  }
}

</mosaic_0001>

<bundles_post_ra>
// kernel: simpleconv_forward.3
= control target key start
LH: loop header
LB: loop body
LE: loop exit
PB: predicated region body
PF: predicated region fallthrough
CT: control target
= control target key end

     0   :  { %s1214_s12 = smov 0   ;;  %s1216_s13 = smov 0   ;;  %s1635_s0 = inlined_call_operand.vmem [shape: f32[1152,25], index: 0, kind: input, shape index: {}]   ;;  %s1636_s1 = inlined_call_operand.vmem [shape: f32[25,32], index: 1, kind: input, shape index: {}]   ;;  %s1637_s2 = inlined_call_operand.vmem [shape: f32[1,32], index: 2, kind: input, shape index: {}]   ;;  %s1638_s3 = inlined_call_operand.vmem [shape: f32[1152,32], index: 3, kind: output, shape index: {}]  }
   0x1   :  { %s1218_s14 = smov 0  }
   0x2 LB: > { %s32_s15 = sadd.s32 1, %s1188_s13  ;;  %p1055_p0 = scmp.ge.s32.totalorder %s1192_s14, 1  ;;  %s1192_s14 = sphi %s1218_s14, %s13_s14   ;;  %s1188_s13 = sphi %s1216_s13, %s1640_s13   ;;  %s1184_s12 = sphi %s1214_s12, %s1639_s12  }
   0x3   : > { %p34_p1 = scmp.ge.s32.totalorder %s32_s15, 2  ;;  %p188_p2 = scmp.lt.s32.totalorder %s1192_s14, 3 }
   0x5   : > { %s1642_s15 = smov (%p34_p1, %s32_s15), 0  ;;  %p189_p3 = pnand %p1055_p0, %p188_p2 }
   0x6   : > { %s229_s20 = smul.u32 (!%p189_p3), 72, %s1184_s12 }
   0x7   : > { %192 = sbr.rel (%p189_p3) target bundleno = 295 (0x127), region = 32 }
   0x8   : > { %p230_p4 = scmp.lt.s32.totalorder (!%p189_p3), %s229_s20, 143 }
   0xc   : > { %v334_v0 = vld [vmem:[%s1636_s1 + $0x18] sm:$0x1]  ;;  %vm556_vm0 = vcmask 1040384   ;;  %v333_v1 = vld [vmem:[%s1636_s1 + $0x10] sm:$0xff]  ;;  %v332_v2 = vld [vmem:[%s1636_s1 + $0x8] sm:$0xff]  ;;  %s1644_s20 = smov (!%p230_p4, %s229_s20), 143 }
   0xd   : > { %1134 = vmatpush.msk.msra.mxu2 %vm556_vm0, %v334_v0  ;;  %1135 = vmatpush.msk.msra.mxu3 %vm556_vm0, %v334_v0  ;;  %v331_v3 = vld [vmem:[%s1636_s1] sm:$0xff]  ;;  %s1056_s25 = sshll.u32 %s1644_s20, 3  ;;  %vm339_vm1 = vcmask 203776   ;;  %vm865_vm2 = vcmask 261120  }
   0xe   : > { %1058 = vmatpush.msk.msra.mxu0 %vm556_vm0, %v334_v0  ;;  %1133 = vmatpush.msk.msra.mxu1 %vm556_vm0, %v334_v0  ;;  %s1252_s28 = scalar_lea.vmem %s1635_s0, %s1056_s25  ;;  %s1398_s6 = scalar_lea.vmem %s1638_s3, %s1056_s25 }
   0xf   : > { %1137 = vmatpush.msra.mxu2 %v333_v1  ;;  %1138 = vmatpush.msra.mxu3 %v333_v1  ;;  %v295_v4 = vld [vmem:[%s1252_s28 + $0x120] sm:$0xff]  ;;  %v313_v5 = vld [vmem:[%s1252_s28 + $0x1b0] sm:$0xff]  ;;  %v296_v8 = vld [vmem:[%s1252_s28 + $0x128] sm:$0xff] }
  0x10   : > { %573 = vmatpush.msra.mxu0 %v333_v1  ;;  %1136 = vmatpush.msra.mxu1 %v333_v1  ;;  %v259_v6 = vld [vmem:[%s1252_s28] sm:$0xff]  ;;  %v277_v7 = vld [vmem:[%s1252_s28 + $0x90] sm:$0xff]  ;;  %v314_v9 = vld [vmem:[%s1252_s28 + $0x1b8] sm:$0xff] }
  0x11   : > { %1140 = vmatpush.msra.mxu2 %v332_v2  ;;  %1141 = vmatpush.msra.mxu3 %v332_v2  ;;  %v260_v10 = vld [vmem:[%s1252_s28 + $0x8] sm:$0xff]  ;;  %v278_v11 = vld [vmem:[%s1252_s28 + $0x98] sm:$0xff]  ;;  %v297_v12 = vld [vmem:[%s1252_s28 + $0x130] sm:$0xff] }
  0x12   : > { %574 = vmatpush.msra.mxu0 %v332_v2  ;;  %1139 = vmatpush.msra.mxu1 %v332_v2  ;;  %v315_v13 = vld [vmem:[%s1252_s28 + $0x1c0] sm:$0xff]  ;;  %v261_v14 = vld [vmem:[%s1252_s28 + $0x10] sm:$0xff]  ;;  %v298_v16 = vld [vmem:[%s1252_s28 + $0x138] sm:$0xff] }
  0x13   : > { %1143 = vmatpush.msra.mxu2 %v331_v3  ;;  %1144 = vmatpush.msra.mxu3 %v331_v3  ;;  %v279_v15 = vld [vmem:[%s1252_s28 + $0xa0] sm:$0xff]  ;;  %v316_v17 = vld [vmem:[%s1252_s28 + $0x1c8] sm:$0xff]  ;;  %v262_v18 = vld [vmem:[%s1252_s28 + $0x18] sm:$0xff] }
  0x14   : > { %575 = vmatpush.msra.mxu0 %v331_v3  ;;  %1142 = vmatpush.msra.mxu1 %v331_v3  ;;  %v280_v19 = vld [vmem:[%s1252_s28 + $0xa8] sm:$0xff]  ;;  %v299_v20 = vld [vmem:[%s1252_s28 + $0x140] sm:$0xff]  ;;  %v317_v21 = vld [vmem:[%s1252_s28 + $0x1d0] sm:$0xff] }
  0x15   : > { %1095 = vmatmul.msk.f32.vlgmr.msra.gmra.mxu2 %vm339_vm1, %v295_v4  ;;  %1113 = vmatmul.msk.f32.vlgmr.msra.gmra.mxu3 %vm339_vm1, %v313_v5  ;;  %v263_v22 = vld [vmem:[%s1252_s28 + $0x20] sm:$0xff]  ;;  %v281_v23 = vld [vmem:[%s1252_s28 + $0xb0] sm:$0xff]  ;;  %v300_v24 = vld [vmem:[%s1252_s28 + $0x148] sm:$0xff] }
  0x16   : > { %1059 = vmatmul.msk.f32.vlgmr.msra.gmra.mxu0 %vm339_vm1, %v259_v6  ;;  %1077 = vmatmul.msk.f32.vlgmr.msra.gmra.mxu1 %vm339_vm1, %v277_v7  ;;  %v318_v25 = vld [vmem:[%s1252_s28 + $0x1d8] sm:$0xff]  ;;  %v264_v26 = vld [vmem:[%s1252_s28 + $0x28] sm:$0xff]  ;;  %v301_v28 = vld [vmem:[%s1252_s28 + $0x150] sm:$0xff] }
  0x17   : > { %v282_v27 = vld [vmem:[%s1252_s28 + $0xb8] sm:$0xff]  ;;  %v319_v29 = vld [vmem:[%s1252_s28 + $0x1e0] sm:$0xff]  ;;  %v265_v30 = vld [vmem:[%s1252_s28 + $0x30] sm:$0xff] }
  0x18   : > { %v283_v31 = vld [vmem:[%s1252_s28 + $0xc0] sm:$0xff]  ;;  %v302_v32 = vld [vmem:[%s1252_s28 + $0x158] sm:$0xff]  ;;  %v320_v33 = vld [vmem:[%s1252_s28 + $0x1e8] sm:$0xff] }
  0x19   : > { %v266_v34 = vld [vmem:[%s1252_s28 + $0x38] sm:$0xff]  ;;  %v284_v35 = vld [vmem:[%s1252_s28 + $0xc8] sm:$0xff]  ;;  %v303_v36 = vld [vmem:[%s1252_s28 + $0x160] sm:$0xff] }
  0x1a   : > { %v321_v37 = vld [vmem:[%s1252_s28 + $0x1f0] sm:$0xff]  ;;  %v267_v38 = vld [vmem:[%s1252_s28 + $0x40] sm:$0xff]  ;;  %v304_v40 = vld [vmem:[%s1252_s28 + $0x168] sm:$0xff] }
  0x1b   : > { %v285_v39 = vld [vmem:[%s1252_s28 + $0xd0] sm:$0xff]  ;;  %v322_v41 = vld [vmem:[%s1252_s28 + $0x1f8] sm:$0xff]  ;;  %v268_v42 = vld [vmem:[%s1252_s28 + $0x48] sm:$0xff] }
  0x1c   : > { %v286_v43 = vld [vmem:[%s1252_s28 + $0xd8] sm:$0xff]  ;;  %v305_v44 = vld [vmem:[%s1252_s28 + $0x170] sm:$0xff]  ;;  %v323_v45 = vld [vmem:[%s1252_s28 + $0x200] sm:$0xff] }
  0x1d   : > { %1096 = vmatmul.msk.f32.gmra.mxu2 %vm339_vm1, %v296_v8  ;;  %1114 = vmatmul.msk.f32.gmra.mxu3 %vm339_vm1, %v314_v9  ;;  %v269_v46 = vld [vmem:[%s1252_s28 + $0x50] sm:$0xff]  ;;  %v287_v47 = vld [vmem:[%s1252_s28 + $0xe0] sm:$0xff]  ;;  %v306_v48 = vld [vmem:[%s1252_s28 + $0x178] sm:$0xff] }
  0x1e   : > { %1060 = vmatmul.msk.f32.gmra.mxu0 %vm339_vm1, %v260_v10  ;;  %1078 = vmatmul.msk.f32.gmra.mxu1 %vm339_vm1, %v278_v11  ;;  %v324_v49 = vld [vmem:[%s1252_s28 + $0x208] sm:$0xff]  ;;  %v270_v50 = vld [vmem:[%s1252_s28 + $0x58] sm:$0xff]  ;;  %v307_v52 = vld [vmem:[%s1252_s28 + $0x180] sm:$0xff] }
  0x1f   : > { %v288_v51 = vld [vmem:[%s1252_s28 + $0xe8] sm:$0xff]  ;;  %v325_v53 = vld [vmem:[%s1252_s28 + $0x210] sm:$0xff]  ;;  %v271_v54 = vld [vmem:[%s1252_s28 + $0x60] sm:$0xff] }
  0x20   : > { %v289_v55 = vld [vmem:[%s1252_s28 + $0xf0] sm:$0xff]  ;;  %v308_v56 = vld [vmem:[%s1252_s28 + $0x188] sm:$0xff]  ;;  %v326_v57 = vld [vmem:[%s1252_s28 + $0x218] sm:$0xff] }
  0x21   : > { %v272_v58 = vld [vmem:[%s1252_s28 + $0x68] sm:$0xff]  ;;  %v290_v59 = vld [vmem:[%s1252_s28 + $0xf8] sm:$0xff]  ;;  %v309_v60 = vld [vmem:[%s1252_s28 + $0x190] sm:$0xff] }
  0x22   : > { %v327_v61 = vld [vmem:[%s1252_s28 + $0x220] sm:$0xff]  ;;  %v273_v62 = vld [vmem:[%s1252_s28 + $0x70] sm:$0xff]  ;;  %v310_v0 = vld [vmem:[%s1252_s28 + $0x198] sm:$0xff] }
  0x23   : > { %v291_v63 = vld [vmem:[%s1252_s28 + $0x100] sm:$0xff]  ;;  %v328_v1 = vld [vmem:[%s1252_s28 + $0x228] sm:$0xff]  ;;  %v274_v2 = vld [vmem:[%s1252_s28 + $0x78] sm:$0xff] }
  0x24   : > { %v292_v3 = vld [vmem:[%s1252_s28 + $0x108] sm:$0xff]  ;;  %v1385_v4 = vld [vmem:[%s1637_s2] ss:$0 sm:$0xff]  ;;  %v329_v6 = vld [vmem:[%s1252_s28 + $0x230] sm:$0xff] }
  0x25   : > { %1097 = vmatmul.msk.f32.gmra.mxu2 %vm339_vm1, %v297_v12  ;;  %1115 = vmatmul.msk.f32.gmra.mxu3 %vm339_vm1, %v315_v13  ;;  %v311_v5 = vld [vmem:[%s1252_s28 + $0x1a0] sm:$0xff]  ;;  %v293_v10 = vld [vmem:[%s1252_s28 + $0x110] sm:$0xff] }
  0x26   : > { %1061 = vmatmul.msk.f32.gmra.mxu0 %vm339_vm1, %v261_v14  ;;  %1079 = vmatmul.msk.f32.gmra.mxu1 %vm339_vm1, %v279_v15  ;;  %v275_v9 = vld [vmem:[%s1252_s28 + $0x80] sm:$0xff] }
  0x2d   : > { %1098 = vmatmul.msk.f32.gmra.mxu2 %vm339_vm1, %v298_v16  ;;  %1116 = vmatmul.msk.f32.gmra.mxu3 %vm339_vm1, %v316_v17 }
  0x2e   : > { %1062 = vmatmul.msk.f32.gmra.mxu0 %vm339_vm1, %v262_v18  ;;  %1080 = vmatmul.msk.f32.gmra.mxu1 %vm339_vm1, %v280_v19  ;;  %v312_v19 = vld [vmem:[%s1252_s28 + $0x1a8] sm:$0xff] }
  0x35   : > { %1099 = vmatmul.msk.f32.gmra.mxu2 %vm339_vm1, %v299_v20  ;;  %1117 = vmatmul.msk.f32.gmra.mxu3 %vm339_vm1, %v317_v21  ;;  %v330_v20 = vld [vmem:[%s1252_s28 + $0x238] sm:$0xff] }
  0x36   : > { %1063 = vmatmul.msk.f32.gmra.mxu0 %vm339_vm1, %v263_v22  ;;  %1081 = vmatmul.msk.f32.gmra.mxu1 %vm339_vm1, %v281_v23 }
  0x3d   : > { %1100 = vmatmul.msk.f32.gmra.mxu2 %vm339_vm1, %v300_v24  ;;  %1118 = vmatmul.msk.f32.gmra.mxu3 %vm339_vm1, %v318_v25  ;;  %v276_v25 = vld [vmem:[%s1252_s28 + $0x88] sm:$0xff] }
  0x3e   : > { %1064 = vmatmul.msk.f32.gmra.mxu0 %vm339_vm1, %v264_v26  ;;  %1082 = vmatmul.msk.f32.gmra.mxu1 %vm339_vm1, %v282_v27  ;;  %v294_v26 = vld [vmem:[%s1252_s28 + $0x118] sm:$0xff] }
  0x45   : > { %1101 = vmatmul.msk.f32.gmra.mxu2 %vm339_vm1, %v301_v28  ;;  %1119 = vmatmul.msk.f32.gmra.mxu3 %vm339_vm1, %v319_v29 }
  0x46   : > { %1065 = vmatmul.msk.f32.gmra.mxu0 %vm339_vm1, %v265_v30  ;;  %1083 = vmatmul.msk.f32.gmra.mxu1 %vm339_vm1, %v283_v31 }
  0x4d   : > { %1102 = vmatmul.msk.f32.gmra.mxu2 %vm339_vm1, %v302_v32  ;;  %1120 = vmatmul.msk.f32.gmra.mxu3 %vm339_vm1, %v320_v33 }
  0x4e   : > { %1066 = vmatmul.msk.f32.gmra.mxu0 %vm339_vm1, %v266_v34  ;;  %1084 = vmatmul.msk.f32.gmra.mxu1 %vm339_vm1, %v284_v35 }
  0x55   : > { %1103 = vmatmul.msk.f32.gmra.mxu2 %vm339_vm1, %v303_v36  ;;  %1121 = vmatmul.msk.f32.gmra.mxu3 %vm339_vm1, %v321_v37 }
  0x56   : > { %1067 = vmatmul.msk.f32.gmra.mxu0 %vm339_vm1, %v267_v38  ;;  %1085 = vmatmul.msk.f32.gmra.mxu1 %vm339_vm1, %v285_v39 }
  0x5d   : > { %1104 = vmatmul.msk.f32.gmra.mxu2 %vm339_vm1, %v304_v40  ;;  %1122 = vmatmul.msk.f32.gmra.mxu3 %vm339_vm1, %v322_v41 }
  0x5e   : > { %1068 = vmatmul.msk.f32.gmra.mxu0 %vm339_vm1, %v268_v42  ;;  %1086 = vmatmul.msk.f32.gmra.mxu1 %vm339_vm1, %v286_v43 }
  0x65   : > { %1105 = vmatmul.msk.f32.gmra.mxu2 %vm339_vm1, %v305_v44  ;;  %1123 = vmatmul.msk.f32.gmra.mxu3 %vm339_vm1, %v323_v45 }
  0x66   : > { %1069 = vmatmul.msk.f32.gmra.mxu0 %vm339_vm1, %v269_v46  ;;  %1087 = vmatmul.msk.f32.gmra.mxu1 %vm339_vm1, %v287_v47 }
  0x6d   : > { %1106 = vmatmul.msk.f32.gmra.mxu2 %vm339_vm1, %v306_v48  ;;  %1124 = vmatmul.msk.f32.gmra.mxu3 %vm339_vm1, %v324_v49 }
  0x6e   : > { %1070 = vmatmul.msk.f32.gmra.mxu0 %vm339_vm1, %v270_v50  ;;  %1088 = vmatmul.msk.f32.gmra.mxu1 %vm339_vm1, %v288_v51 }
  0x75   : > { %1107 = vmatmul.msk.f32.gmra.mxu2 %vm339_vm1, %v307_v52  ;;  %1125 = vmatmul.msk.f32.gmra.mxu3 %vm339_vm1, %v325_v53 }
  0x76   : > { %1071 = vmatmul.msk.f32.gmra.mxu0 %vm339_vm1, %v271_v54  ;;  %1089 = vmatmul.msk.f32.gmra.mxu1 %vm339_vm1, %v289_v55 }
  0x7d   : > { %1108 = vmatmul.msk.f32.gmra.mxu2 %vm339_vm1, %v308_v56  ;;  %1126 = vmatmul.msk.f32.gmra.mxu3 %vm339_vm1, %v326_v57 }
  0x7e   : > { %1072 = vmatmul.msk.f32.gmra.mxu0 %vm339_vm1, %v272_v58  ;;  %1090 = vmatmul.msk.f32.gmra.mxu1 %vm339_vm1, %v290_v59 }
  0x85   : > { %1109 = vmatmul.msk.f32.gmra.mxu2 %vm339_vm1, %v309_v60  ;;  %1127 = vmatmul.msk.f32.gmra.mxu3 %vm339_vm1, %v327_v61 }
  0x86   : > { %1073 = vmatmul.msk.f32.gmra.mxu0 %vm339_vm1, %v273_v62  ;;  %1091 = vmatmul.msk.f32.gmra.mxu1 %vm339_vm1, %v291_v63 }
  0x8d   : > { %1110 = vmatmul.msk.f32.gmra.mxu2 %vm339_vm1, %v310_v0  ;;  %1128 = vmatmul.msk.f32.gmra.mxu3 %vm339_vm1, %v328_v1 }
  0x8e   : > { %1074 = vmatmul.msk.f32.gmra.mxu0 %vm339_vm1, %v274_v2  ;;  %1092 = vmatmul.msk.f32.gmra.mxu1 %vm339_vm1, %v292_v3 }
  0x93   : > { %v577_v7 = vpop.f32.mrf.mxu0  ;;  %v631_v8 = vpop.f32.mrf.mxu1 }
  0x94   : > { %v578_v11 = vadd.f32 %v1385_v4, %v577_v7  ;;  %v632_v12 = vadd.f32 %v1385_v4, %v631_v8 }
  0x95   : > { %1111 = vmatmul.msk.f32.gmra.mxu2 %vm339_vm1, %v311_v5  ;;  %1129 = vmatmul.msk.f32.gmra.mxu3 %vm339_vm1, %v329_v6 }
  0x96   : > { %v793_v13 = vmax.f32 %v578_v11, 0.0  ;;  %v811_v14 = vmax.f32 %v632_v12, 0.0  ;;  %1075 = vmatmul.msk.f32.gmra.mxu0 %vm339_vm1, %v275_v9  ;;  %1093 = vmatmul.msk.f32.gmra.mxu1 %vm339_vm1, %v293_v10 }
  0x98   : > { %866 = vst.msk [vmem:[%s1398_s6] sm:$0xff] %vm865_vm2, %v793_v13  ;;  %v685_v15 = vpop.f32.mrf.mxu2  ;;  %v739_v16 = vpop.f32.mrf.mxu3 }
  0x99   : > { %884 = vst.msk [vmem:[%s1398_s6 + $0x90] sm:$0xff] %vm865_vm2, %v811_v14  ;;  %v686_v17 = vadd.f32 %v1385_v4, %v685_v15  ;;  %v740_v18 = vadd.f32 %v1385_v4, %v739_v16 }
  0x9b   : > { %v829_v21 = vmax.f32 %v686_v17, 0.0  ;;  %v847_v22 = vmax.f32 %v740_v18, 0.0  ;;  %v580_v23 = vpop.f32.mrf.mxu0  ;;  %v634_v24 = vpop.f32.mrf.mxu1 }
  0x9c   : > { %v581_v27 = vadd.f32 %v1385_v4, %v580_v23  ;;  %v635_v28 = vadd.f32 %v1385_v4, %v634_v24 }
  0x9d   : > { %902 = vst.msk [vmem:[%s1398_s6 + $0x120] sm:$0xff] %vm865_vm2, %v829_v21  ;;  %1112 = vmatmul.msk.f32.gmra.mxu2 %vm339_vm1, %v312_v19  ;;  %1130 = vmatmul.msk.f32.gmra.mxu3 %vm339_vm1, %v330_v20 }
  0x9e   : > { %920 = vst.msk [vmem:[%s1398_s6 + $0x1b0] sm:$0xff] %vm865_vm2, %v847_v22  ;;  %v794_v29 = vmax.f32 %v581_v27, 0.0  ;;  %v812_v30 = vmax.f32 %v635_v28, 0.0  ;;  %1076 = vmatmul.msk.f32.gmra.mxu0 %vm339_vm1, %v276_v25  ;;  %1094 = vmatmul.msk.f32.gmra.mxu1 %vm339_vm1, %v294_v26 }
  0xa0   : > { %867 = vst.msk [vmem:[%s1398_s6 + $0x8] sm:$0xff] %vm865_vm2, %v794_v29  ;;  %v688_v31 = vpop.f32.mrf.mxu2  ;;  %v742_v32 = vpop.f32.mrf.mxu3 }
  0xa1   : > { %885 = vst.msk [vmem:[%s1398_s6 + $0x98] sm:$0xff] %vm865_vm2, %v812_v30  ;;  %v689_v33 = vadd.f32 %v1385_v4, %v688_v31  ;;  %v743_v34 = vadd.f32 %v1385_v4, %v742_v32 }
  0xa3   : > { %v830_v35 = vmax.f32 %v689_v33, 0.0  ;;  %v848_v36 = vmax.f32 %v743_v34, 0.0  ;;  %v583_v37 = vpop.f32.mrf.mxu0  ;;  %v637_v38 = vpop.f32.mrf.mxu1 }
  0xa4   : > { %v584_v39 = vadd.f32 %v1385_v4, %v583_v37  ;;  %v638_v40 = vadd.f32 %v1385_v4, %v637_v38 }
  0xa5   : > { %903 = vst.msk [vmem:[%s1398_s6 + $0x128] sm:$0xff] %vm865_vm2, %v830_v35 }
  0xa6   : > { %921 = vst.msk [vmem:[%s1398_s6 + $0x1b8] sm:$0xff] %vm865_vm2, %v848_v36  ;;  %v795_v41 = vmax.f32 %v584_v39, 0.0  ;;  %v813_v42 = vmax.f32 %v638_v40, 0.0 }
  0xa8   : > { %868 = vst.msk [vmem:[%s1398_s6 + $0x10] sm:$0xff] %vm865_vm2, %v795_v41  ;;  %v691_v43 = vpop.f32.mrf.mxu2  ;;  %v745_v44 = vpop.f32.mrf.mxu3 }
  0xa9   : > { %886 = vst.msk [vmem:[%s1398_s6 + $0xa0] sm:$0xff] %vm865_vm2, %v813_v42  ;;  %v692_v45 = vadd.f32 %v1385_v4, %v691_v43  ;;  %v746_v46 = vadd.f32 %v1385_v4, %v745_v44 }
  0xab   : > { %v831_v47 = vmax.f32 %v692_v45, 0.0  ;;  %v849_v48 = vmax.f32 %v746_v46, 0.0  ;;  %v586_v49 = vpop.f32.mrf.mxu0  ;;  %v640_v50 = vpop.f32.mrf.mxu1 }
  0xac   : > { %v587_v51 = vadd.f32 %v1385_v4, %v586_v49  ;;  %v641_v52 = vadd.f32 %v1385_v4, %v640_v50 }
  0xad   : > { %904 = vst.msk [vmem:[%s1398_s6 + $0x130] sm:$0xff] %vm865_vm2, %v831_v47 }
  0xae   : > { %922 = vst.msk [vmem:[%s1398_s6 + $0x1c0] sm:$0xff] %vm865_vm2, %v849_v48  ;;  %v796_v53 = vmax.f32 %v587_v51, 0.0  ;;  %v814_v54 = vmax.f32 %v641_v52, 0.0 }
  0xb0   : > { %869 = vst.msk [vmem:[%s1398_s6 + $0x18] sm:$0xff] %vm865_vm2, %v796_v53  ;;  %v694_v55 = vpop.f32.mrf.mxu2  ;;  %v748_v56 = vpop.f32.mrf.mxu3 }
  0xb1   : > { %887 = vst.msk [vmem:[%s1398_s6 + $0xa8] sm:$0xff] %vm865_vm2, %v814_v54  ;;  %v695_v57 = vadd.f32 %v1385_v4, %v694_v55  ;;  %v749_v58 = vadd.f32 %v1385_v4, %v748_v56 }
  0xb3   : > { %v832_v59 = vmax.f32 %v695_v57, 0.0  ;;  %v850_v60 = vmax.f32 %v749_v58, 0.0  ;;  %v589_v61 = vpop.f32.mrf.mxu0  ;;  %v643_v62 = vpop.f32.mrf.mxu1 }
  0xb4   : > { %v590_v63 = vadd.f32 %v1385_v4, %v589_v61  ;;  %v644_v0 = vadd.f32 %v1385_v4, %v643_v62 }
  0xb5   : > { %905 = vst.msk [vmem:[%s1398_s6 + $0x138] sm:$0xff] %vm865_vm2, %v832_v59 }
  0xb6   : > { %923 = vst.msk [vmem:[%s1398_s6 + $0x1c8] sm:$0xff] %vm865_vm2, %v850_v60  ;;  %v797_v1 = vmax.f32 %v590_v63, 0.0  ;;  %v815_v2 = vmax.f32 %v644_v0, 0.0 }
  0xb8   : > { %870 = vst.msk [vmem:[%s1398_s6 + $0x20] sm:$0xff] %vm865_vm2, %v797_v1  ;;  %v697_v3 = vpop.f32.mrf.mxu2  ;;  %v751_v5 = vpop.f32.mrf.mxu3 }
  0xb9   : > { %888 = vst.msk [vmem:[%s1398_s6 + $0xb0] sm:$0xff] %vm865_vm2, %v815_v2  ;;  %v698_v6 = vadd.f32 %v1385_v4, %v697_v3  ;;  %v752_v7 = vadd.f32 %v1385_v4, %v751_v5 }
  0xbb   : > { %v833_v8 = vmax.f32 %v698_v6, 0.0  ;;  %v851_v9 = vmax.f32 %v752_v7, 0.0  ;;  %v592_v10 = vpop.f32.mrf.mxu0  ;;  %v646_v11 = vpop.f32.mrf.mxu1 }
  0xbc   : > { %v593_v12 = vadd.f32 %v1385_v4, %v592_v10  ;;  %v647_v13 = vadd.f32 %v1385_v4, %v646_v11 }
  0xbd   : > { %906 = vst.msk [vmem:[%s1398_s6 + $0x140] sm:$0xff] %vm865_vm2, %v833_v8 }
  0xbe   : > { %924 = vst.msk [vmem:[%s1398_s6 + $0x1d0] sm:$0xff] %vm865_vm2, %v851_v9  ;;  %v798_v14 = vmax.f32 %v593_v12, 0.0  ;;  %v816_v15 = vmax.f32 %v647_v13, 0.0 }
  0xc0   : > { %871 = vst.msk [vmem:[%s1398_s6 + $0x28] sm:$0xff] %vm865_vm2, %v798_v14  ;;  %v700_v16 = vpop.f32.mrf.mxu2  ;;  %v754_v17 = vpop.f32.mrf.mxu3 }
  0xc1   : > { %889 = vst.msk [vmem:[%s1398_s6 + $0xb8] sm:$0xff] %vm865_vm2, %v816_v15  ;;  %v701_v18 = vadd.f32 %v1385_v4, %v700_v16  ;;  %v755_v19 = vadd.f32 %v1385_v4, %v754_v17 }
  0xc3   : > { %v834_v20 = vmax.f32 %v701_v18, 0.0  ;;  %v852_v21 = vmax.f32 %v755_v19, 0.0  ;;  %v595_v22 = vpop.f32.mrf.mxu0  ;;  %v649_v23 = vpop.f32.mrf.mxu1 }
  0xc4   : > { %v596_v24 = vadd.f32 %v1385_v4, %v595_v22  ;;  %v650_v25 = vadd.f32 %v1385_v4, %v649_v23 }
  0xc5   : > { %907 = vst.msk [vmem:[%s1398_s6 + $0x148] sm:$0xff] %vm865_vm2, %v834_v20 }
  0xc6   : > { %925 = vst.msk [vmem:[%s1398_s6 + $0x1d8] sm:$0xff] %vm865_vm2, %v852_v21  ;;  %v799_v26 = vmax.f32 %v596_v24, 0.0  ;;  %v817_v27 = vmax.f32 %v650_v25, 0.0 }
  0xc8   : > { %872 = vst.msk [vmem:[%s1398_s6 + $0x30] sm:$0xff] %vm865_vm2, %v799_v26  ;;  %v703_v28 = vpop.f32.mrf.mxu2  ;;  %v757_v29 = vpop.f32.mrf.mxu3 }
  0xc9   : > { %890 = vst.msk [vmem:[%s1398_s6 + $0xc0] sm:$0xff] %vm865_vm2, %v817_v27  ;;  %v704_v30 = vadd.f32 %v1385_v4, %v703_v28  ;;  %v758_v31 = vadd.f32 %v1385_v4, %v757_v29 }
  0xcb   : > { %v835_v32 = vmax.f32 %v704_v30, 0.0  ;;  %v853_v33 = vmax.f32 %v758_v31, 0.0  ;;  %v598_v34 = vpop.f32.mrf.mxu0  ;;  %v652_v35 = vpop.f32.mrf.mxu1 }
  0xcc   : > { %v599_v36 = vadd.f32 %v1385_v4, %v598_v34  ;;  %v653_v37 = vadd.f32 %v1385_v4, %v652_v35 }
  0xcd   : > { %908 = vst.msk [vmem:[%s1398_s6 + $0x150] sm:$0xff] %vm865_vm2, %v835_v32 }
  0xce   : > { %926 = vst.msk [vmem:[%s1398_s6 + $0x1e0] sm:$0xff] %vm865_vm2, %v853_v33  ;;  %v800_v38 = vmax.f32 %v599_v36, 0.0  ;;  %v818_v39 = vmax.f32 %v653_v37, 0.0 }
  0xd0   : > { %873 = vst.msk [vmem:[%s1398_s6 + $0x38] sm:$0xff] %vm865_vm2, %v800_v38  ;;  %v706_v40 = vpop.f32.mrf.mxu2  ;;  %v760_v41 = vpop.f32.mrf.mxu3 }
  0xd1   : > { %891 = vst.msk [vmem:[%s1398_s6 + $0xc8] sm:$0xff] %vm865_vm2, %v818_v39  ;;  %v707_v42 = vadd.f32 %v1385_v4, %v706_v40  ;;  %v761_v43 = vadd.f32 %v1385_v4, %v760_v41 }
  0xd3   : > { %v836_v44 = vmax.f32 %v707_v42, 0.0  ;;  %v854_v45 = vmax.f32 %v761_v43, 0.0  ;;  %v601_v46 = vpop.f32.mrf.mxu0  ;;  %v655_v47 = vpop.f32.mrf.mxu1 }
  0xd4   : > { %v602_v48 = vadd.f32 %v1385_v4, %v601_v46  ;;  %v656_v49 = vadd.f32 %v1385_v4, %v655_v47 }
  0xd5   : > { %909 = vst.msk [vmem:[%s1398_s6 + $0x158] sm:$0xff] %vm865_vm2, %v836_v44 }
  0xd6   : > { %927 = vst.msk [vmem:[%s1398_s6 + $0x1e8] sm:$0xff] %vm865_vm2, %v854_v45  ;;  %v801_v50 = vmax.f32 %v602_v48, 0.0  ;;  %v819_v51 = vmax.f32 %v656_v49, 0.0 }
  0xd8   : > { %874 = vst.msk [vmem:[%s1398_s6 + $0x40] sm:$0xff] %vm865_vm2, %v801_v50  ;;  %v709_v52 = vpop.f32.mrf.mxu2  ;;  %v763_v53 = vpop.f32.mrf.mxu3 }
  0xd9   : > { %892 = vst.msk [vmem:[%s1398_s6 + $0xd0] sm:$0xff] %vm865_vm2, %v819_v51  ;;  %v710_v54 = vadd.f32 %v1385_v4, %v709_v52  ;;  %v764_v55 = vadd.f32 %v1385_v4, %v763_v53 }
  0xdb   : > { %v837_v56 = vmax.f32 %v710_v54, 0.0  ;;  %v855_v57 = vmax.f32 %v764_v55, 0.0  ;;  %v604_v58 = vpop.f32.mrf.mxu0  ;;  %v658_v59 = vpop.f32.mrf.mxu1 }
  0xdc   : > { %v605_v60 = vadd.f32 %v1385_v4, %v604_v58  ;;  %v659_v61 = vadd.f32 %v1385_v4, %v658_v59 }
  0xdd   : > { %910 = vst.msk [vmem:[%s1398_s6 + $0x160] sm:$0xff] %vm865_vm2, %v837_v56 }
  0xde   : > { %928 = vst.msk [vmem:[%s1398_s6 + $0x1f0] sm:$0xff] %vm865_vm2, %v855_v57  ;;  %v802_v62 = vmax.f32 %v605_v60, 0.0  ;;  %v820_v63 = vmax.f32 %v659_v61, 0.0 }
  0xe0   : > { %875 = vst.msk [vmem:[%s1398_s6 + $0x48] sm:$0xff] %vm865_vm2, %v802_v62  ;;  %v712_v0 = vpop.f32.mrf.mxu2  ;;  %v766_v1 = vpop.f32.mrf.mxu3 }
  0xe1   : > { %893 = vst.msk [vmem:[%s1398_s6 + $0xd8] sm:$0xff] %vm865_vm2, %v820_v63  ;;  %v713_v2 = vadd.f32 %v1385_v4, %v712_v0  ;;  %v767_v3 = vadd.f32 %v1385_v4, %v766_v1 }
  0xe3   : > { %v838_v5 = vmax.f32 %v713_v2, 0.0  ;;  %v856_v6 = vmax.f32 %v767_v3, 0.0  ;;  %v607_v7 = vpop.f32.mrf.mxu0  ;;  %v661_v8 = vpop.f32.mrf.mxu1 }
  0xe4   : > { %v608_v9 = vadd.f32 %v1385_v4, %v607_v7  ;;  %v662_v10 = vadd.f32 %v1385_v4, %v661_v8 }
  0xe5   : > { %911 = vst.msk [vmem:[%s1398_s6 + $0x168] sm:$0xff] %vm865_vm2, %v838_v5 }
  0xe6   : > { %929 = vst.msk [vmem:[%s1398_s6 + $0x1f8] sm:$0xff] %vm865_vm2, %v856_v6  ;;  %v803_v11 = vmax.f32 %v608_v9, 0.0  ;;  %v821_v12 = vmax.f32 %v662_v10, 0.0 }
  0xe8   : > { %876 = vst.msk [vmem:[%s1398_s6 + $0x50] sm:$0xff] %vm865_vm2, %v803_v11  ;;  %v715_v13 = vpop.f32.mrf.mxu2  ;;  %v769_v14 = vpop.f32.mrf.mxu3 }
  0xe9   : > { %894 = vst.msk [vmem:[%s1398_s6 + $0xe0] sm:$0xff] %vm865_vm2, %v821_v12  ;;  %v716_v15 = vadd.f32 %v1385_v4, %v715_v13  ;;  %v770_v16 = vadd.f32 %v1385_v4, %v769_v14 }
  0xeb   : > { %v839_v17 = vmax.f32 %v716_v15, 0.0  ;;  %v857_v18 = vmax.f32 %v770_v16, 0.0  ;;  %v610_v19 = vpop.f32.mrf.mxu0  ;;  %v664_v20 = vpop.f32.mrf.mxu1 }
  0xec   : > { %v611_v21 = vadd.f32 %v1385_v4, %v610_v19  ;;  %v665_v22 = vadd.f32 %v1385_v4, %v664_v20 }
  0xed   : > { %912 = vst.msk [vmem:[%s1398_s6 + $0x170] sm:$0xff] %vm865_vm2, %v839_v17 }
  0xee   : > { %930 = vst.msk [vmem:[%s1398_s6 + $0x200] sm:$0xff] %vm865_vm2, %v857_v18  ;;  %v804_v23 = vmax.f32 %v611_v21, 0.0  ;;  %v822_v24 = vmax.f32 %v665_v22, 0.0 }
  0xf0   : > { %877 = vst.msk [vmem:[%s1398_s6 + $0x58] sm:$0xff] %vm865_vm2, %v804_v23  ;;  %v718_v25 = vpop.f32.mrf.mxu2  ;;  %v772_v26 = vpop.f32.mrf.mxu3 }
  0xf1   : > { %895 = vst.msk [vmem:[%s1398_s6 + $0xe8] sm:$0xff] %vm865_vm2, %v822_v24  ;;  %v719_v27 = vadd.f32 %v1385_v4, %v718_v25  ;;  %v773_v28 = vadd.f32 %v1385_v4, %v772_v26 }
  0xf3   : > { %v840_v29 = vmax.f32 %v719_v27, 0.0  ;;  %v858_v30 = vmax.f32 %v773_v28, 0.0  ;;  %v613_v31 = vpop.f32.mrf.mxu0  ;;  %v667_v32 = vpop.f32.mrf.mxu1 }
  0xf4   : > { %v614_v33 = vadd.f32 %v1385_v4, %v613_v31  ;;  %v668_v34 = vadd.f32 %v1385_v4, %v667_v32 }
  0xf5   : > { %913 = vst.msk [vmem:[%s1398_s6 + $0x178] sm:$0xff] %vm865_vm2, %v840_v29 }
  0xf6   : > { %931 = vst.msk [vmem:[%s1398_s6 + $0x208] sm:$0xff] %vm865_vm2, %v858_v30  ;;  %v805_v35 = vmax.f32 %v614_v33, 0.0  ;;  %v823_v36 = vmax.f32 %v668_v34, 0.0 }
  0xf8   : > { %878 = vst.msk [vmem:[%s1398_s6 + $0x60] sm:$0xff] %vm865_vm2, %v805_v35  ;;  %v721_v37 = vpop.f32.mrf.mxu2  ;;  %v775_v38 = vpop.f32.mrf.mxu3 }
  0xf9   : > { %896 = vst.msk [vmem:[%s1398_s6 + $0xf0] sm:$0xff] %vm865_vm2, %v823_v36  ;;  %v722_v39 = vadd.f32 %v1385_v4, %v721_v37  ;;  %v776_v40 = vadd.f32 %v1385_v4, %v775_v38 }
  0xfb   : > { %v841_v41 = vmax.f32 %v722_v39, 0.0  ;;  %v859_v42 = vmax.f32 %v776_v40, 0.0  ;;  %v616_v43 = vpop.f32.mrf.mxu0  ;;  %v670_v44 = vpop.f32.mrf.mxu1 }
  0xfc   : > { %v617_v45 = vadd.f32 %v1385_v4, %v616_v43  ;;  %v671_v46 = vadd.f32 %v1385_v4, %v670_v44 }
  0xfd   : > { %914 = vst.msk [vmem:[%s1398_s6 + $0x180] sm:$0xff] %vm865_vm2, %v841_v41 }
  0xfe   : > { %932 = vst.msk [vmem:[%s1398_s6 + $0x210] sm:$0xff] %vm865_vm2, %v859_v42  ;;  %v806_v47 = vmax.f32 %v617_v45, 0.0  ;;  %v824_v48 = vmax.f32 %v671_v46, 0.0 }
 0x100   : > { %879 = vst.msk [vmem:[%s1398_s6 + $0x68] sm:$0xff] %vm865_vm2, %v806_v47  ;;  %v724_v49 = vpop.f32.mrf.mxu2  ;;  %v778_v50 = vpop.f32.mrf.mxu3 }
 0x101   : > { %897 = vst.msk [vmem:[%s1398_s6 + $0xf8] sm:$0xff] %vm865_vm2, %v824_v48  ;;  %v725_v51 = vadd.f32 %v1385_v4, %v724_v49  ;;  %v779_v52 = vadd.f32 %v1385_v4, %v778_v50 }
 0x103   : > { %v842_v53 = vmax.f32 %v725_v51, 0.0  ;;  %v860_v54 = vmax.f32 %v779_v52, 0.0  ;;  %v619_v55 = vpop.f32.mrf.mxu0  ;;  %v673_v56 = vpop.f32.mrf.mxu1 }
 0x104   : > { %v620_v57 = vadd.f32 %v1385_v4, %v619_v55  ;;  %v674_v58 = vadd.f32 %v1385_v4, %v673_v56 }
 0x105   : > { %915 = vst.msk [vmem:[%s1398_s6 + $0x188] sm:$0xff] %vm865_vm2, %v842_v53 }
 0x106   : > { %933 = vst.msk [vmem:[%s1398_s6 + $0x218] sm:$0xff] %vm865_vm2, %v860_v54  ;;  %v807_v59 = vmax.f32 %v620_v57, 0.0  ;;  %v825_v60 = vmax.f32 %v674_v58, 0.0 }
 0x108   : > { %880 = vst.msk [vmem:[%s1398_s6 + $0x70] sm:$0xff] %vm865_vm2, %v807_v59  ;;  %v727_v61 = vpop.f32.mrf.mxu2  ;;  %v781_v62 = vpop.f32.mrf.mxu3 }
 0x109   : > { %898 = vst.msk [vmem:[%s1398_s6 + $0x100] sm:$0xff] %vm865_vm2, %v825_v60  ;;  %v728_v63 = vadd.f32 %v1385_v4, %v727_v61  ;;  %v782_v0 = vadd.f32 %v1385_v4, %v781_v62 }
 0x10b   : > { %v843_v1 = vmax.f32 %v728_v63, 0.0  ;;  %v861_v2 = vmax.f32 %v782_v0, 0.0  ;;  %v622_v3 = vpop.f32.mrf.mxu0  ;;  %v676_v5 = vpop.f32.mrf.mxu1 }
 0x10c   : > { %v623_v6 = vadd.f32 %v1385_v4, %v622_v3  ;;  %v677_v7 = vadd.f32 %v1385_v4, %v676_v5 }
 0x10d   : > { %916 = vst.msk [vmem:[%s1398_s6 + $0x190] sm:$0xff] %vm865_vm2, %v843_v1 }
 0x10e   : > { %934 = vst.msk [vmem:[%s1398_s6 + $0x220] sm:$0xff] %vm865_vm2, %v861_v2  ;;  %v808_v8 = vmax.f32 %v623_v6, 0.0  ;;  %v826_v9 = vmax.f32 %v677_v7, 0.0 }
 0x110   : > { %881 = vst.msk [vmem:[%s1398_s6 + $0x78] sm:$0xff] %vm865_vm2, %v808_v8  ;;  %v730_v10 = vpop.f32.mrf.mxu2  ;;  %v784_v11 = vpop.f32.mrf.mxu3 }
 0x111   : > { %899 = vst.msk [vmem:[%s1398_s6 + $0x108] sm:$0xff] %vm865_vm2, %v826_v9  ;;  %v731_v12 = vadd.f32 %v1385_v4, %v730_v10  ;;  %v785_v13 = vadd.f32 %v1385_v4, %v784_v11 }
 0x113   : > { %v844_v14 = vmax.f32 %v731_v12, 0.0  ;;  %v862_v15 = vmax.f32 %v785_v13, 0.0  ;;  %v625_v16 = vpop.f32.mrf.mxu0  ;;  %v679_v17 = vpop.f32.mrf.mxu1 }
 0x114   : > { %v626_v18 = vadd.f32 %v1385_v4, %v625_v16  ;;  %v680_v19 = vadd.f32 %v1385_v4, %v679_v17 }
 0x115   : > { %917 = vst.msk [vmem:[%s1398_s6 + $0x198] sm:$0xff] %vm865_vm2, %v844_v14 }
 0x116   : > { %935 = vst.msk [vmem:[%s1398_s6 + $0x228] sm:$0xff] %vm865_vm2, %v862_v15  ;;  %v809_v20 = vmax.f32 %v626_v18, 0.0  ;;  %v827_v21 = vmax.f32 %v680_v19, 0.0 }
 0x118   : > { %882 = vst.msk [vmem:[%s1398_s6 + $0x80] sm:$0xff] %vm865_vm2, %v809_v20  ;;  %v733_v22 = vpop.f32.mrf.mxu2  ;;  %v787_v23 = vpop.f32.mrf.mxu3 }
 0x119   : > { %900 = vst.msk [vmem:[%s1398_s6 + $0x110] sm:$0xff] %vm865_vm2, %v827_v21  ;;  %v734_v24 = vadd.f32 %v1385_v4, %v733_v22  ;;  %v788_v25 = vadd.f32 %v1385_v4, %v787_v23 }
 0x11b   : > { %v845_v26 = vmax.f32 %v734_v24, 0.0  ;;  %v863_v27 = vmax.f32 %v788_v25, 0.0  ;;  %v628_v28 = vpop.f32.mrf.mxu0  ;;  %v682_v29 = vpop.f32.mrf.mxu1 }
 0x11c   : > { %v629_v30 = vadd.f32 %v1385_v4, %v628_v28  ;;  %v683_v31 = vadd.f32 %v1385_v4, %v682_v29 }
 0x11d   : > { %918 = vst.msk [vmem:[%s1398_s6 + $0x1a0] sm:$0xff] %vm865_vm2, %v845_v26 }
 0x11e   : > { %936 = vst.msk [vmem:[%s1398_s6 + $0x230] sm:$0xff] %vm865_vm2, %v863_v27  ;;  %v810_v32 = vmax.f32 %v629_v30, 0.0  ;;  %v828_v33 = vmax.f32 %v683_v31, 0.0 }
 0x120   : > { %883 = vst.msk [vmem:[%s1398_s6 + $0x88] sm:$0xff] %vm865_vm2, %v810_v32  ;;  %v736_v34 = vpop.f32.mrf.mxu2  ;;  %v790_v35 = vpop.f32.mrf.mxu3 }
 0x121   : > { %901 = vst.msk [vmem:[%s1398_s6 + $0x118] sm:$0xff] %vm865_vm2, %v828_v33  ;;  %v737_v36 = vadd.f32 %v1385_v4, %v736_v34  ;;  %v791_v37 = vadd.f32 %v1385_v4, %v790_v35 }
 0x123   : > { %v846_v38 = vmax.f32 %v737_v36, 0.0  ;;  %v864_v39 = vmax.f32 %v791_v37, 0.0 }
 0x125   : > { %919 = vst.msk [vmem:[%s1398_s6 + $0x1a8] sm:$0xff] %vm865_vm2, %v846_v38 }
 0x126   : > { %937 = vst.msk [vmem:[%s1398_s6 + $0x238] sm:$0xff] %vm865_vm2, %v864_v39 }
 0x127 PF: > { %s13_s14 = sadd.s32 1, %s1192_s14   ;;  %s1639_s12 = smov %s1188_s13 }
 0x128   : > { %p10_p5 = scmp.ge.s32.totalorder %s13_s14, 4   ;;  %s1640_s13 = smov %s1642_s15 }
 0x12a   :  { %12 = sbr.rel (!%p10_p5) target bundleno = 2 (0x2), region = 68 }

// kernel: simpleconv_forward.4
= control target key start
LH: loop header
LB: loop body
LE: loop exit
PB: predicated region body
PF: predicated region fallthrough
CT: control target
= control target key end

     0   :  { %vm129_vm0 = vcmask 261120   ;;  %vm506_vm1 = vcmask 523264   ;;  %s1207_s1 = inlined_call_operand.vmem [shape: f32[288,64], index: 1, kind: input, shape index: {}]   ;;  %s1208_s0 = inlined_call_operand.vmem [shape: f32[200,288], index: 0, kind: input, shape index: {}]   ;;  %s1209_s2 = inlined_call_operand.vmem [shape: f32[1,64], index: 2, kind: input, shape index: {}]   ;;  %s1210_s3 = inlined_call_operand.vmem [shape: f32[200,64], index: 3, kind: output, shape index: {}]  }
   0x1   :  { %v104_v0 = vld [vmem:[%s1207_s1 + $0x78] sm:$0xff]  ;;  %v103_v2 = vld [vmem:[%s1207_s1 + $0x70] sm:$0xff]  ;;  %v102_v5 = vld [vmem:[%s1207_s1 + $0x68] sm:$0xff] }
   0x2   :  { %v624_v1 = vld [vmem:[%s1207_s1 + $0x118] sm:$0xff]  ;;  %205 = vmatpush.msra.mxu0 %v104_v0  ;;  %561 = vmatpush.msra.mxu3 %v104_v0  ;;  %v637_v4 = vld [vmem:[%s1207_s1 + $0x110] sm:$0xff]  ;;  %v652_v7 = vld [vmem:[%s1207_s1 + $0x108] sm:$0xff] }
   0x3   :  { %v632_v3 = vld [vmem:[%s1207_s1 + $0xf8] sm:$0xff]  ;;  %401 = vmatpush.msra.mxu2 %v624_v1  ;;  %v647_v6 = vld [vmem:[%s1207_s1 + $0xf0] sm:$0xff]  ;;  %v657_v8 = vld [vmem:[%s1207_s1 + $0xe8] sm:$0xff] }
   0x4   :  { %297 = vmatpush.msra.mxu1 %v632_v3  ;;  %206 = vmatpush.msra.mxu0 %v103_v2  ;;  %v101_v9 = vld [vmem:[%s1207_s1 + $0x60] sm:$0xff]  ;;  %v16_v12 = vld [vmem:[%s1208_s0 + $0x10] sm:$0xff]  ;;  %v100_v13 = vld [vmem:[%s1207_s1 + $0x58] sm:$0xff] }
   0x5   :  { %562 = vmatpush.msra.mxu3 %v103_v2  ;;  %402 = vmatpush.msra.mxu2 %v637_v4  ;;  %v667_v10 = vld [vmem:[%s1207_s1 + $0x100] sm:$0xff]  ;;  %v685_v14 = vld [vmem:[%s1207_s1 + $0xd8] sm:$0xff]  ;;  %v99_v15 = vld [vmem:[%s1207_s1 + $0x50] sm:$0xff] }
   0x6   :  { %298 = vmatpush.msra.mxu1 %v647_v6  ;;  %207 = vmatpush.msra.mxu0 %v102_v5  ;;  %v672_v11 = vld [vmem:[%s1207_s1 + $0xe0] sm:$0xff]  ;;  %v696_v16 = vld [vmem:[%s1207_s1 + $0xd0] sm:$0xff]  ;;  %v98_v17 = vld [vmem:[%s1207_s1 + $0x48] sm:$0xff] }
   0x7   :  { %563 = vmatpush.msra.mxu3 %v102_v5  ;;  %403 = vmatpush.msra.mxu2 %v652_v7  ;;  %v705_v18 = vld [vmem:[%s1207_s1 + $0xc8] sm:$0xff]  ;;  %v97_v19 = vld [vmem:[%s1207_s1 + $0x40] sm:$0xff]  ;;  %v96_v22 = vld [vmem:[%s1207_s1 + $0x38] sm:$0xff] }
   0x8   :  { %299 = vmatpush.msra.mxu1 %v657_v8  ;;  %208 = vmatpush.msra.mxu0 %v101_v9  ;;  %v714_v20 = vld [vmem:[%s1207_s1 + $0xc0] sm:$0xff]  ;;  %v19_v21 = vld [vmem:[%s1208_s0 + $0x28] sm:$0xff]  ;;  %v726_v23 = vld [vmem:[%s1207_s1 + $0xb8] sm:$0xff] }
   0x9   :  { %564 = vmatpush.msra.mxu3 %v101_v9  ;;  %404 = vmatpush.msra.mxu2 %v667_v10  ;;  %v95_v24 = vld [vmem:[%s1207_s1 + $0x30] sm:$0xff]  ;;  %v94_v26 = vld [vmem:[%s1207_s1 + $0x28] sm:$0xff]  ;;  %v93_v28 = vld [vmem:[%s1207_s1 + $0x20] sm:$0xff] }
   0xa   :  { %300 = vmatpush.msra.mxu1 %v672_v11  ;;  %536 = vmatmul.msk.f32.vlgmr.msra.gmra.mxu2 %vm129_vm0, %v16_v12  ;;  %v736_v25 = vld [vmem:[%s1207_s1 + $0xb0] sm:$0xff]  ;;  %v745_v27 = vld [vmem:[%s1207_s1 + $0xa8] sm:$0xff]  ;;  %v754_v29 = vld [vmem:[%s1207_s1 + $0xa0] sm:$0xff] }
   0xb   :  { %209 = vmatpush.msra.mxu0 %v100_v13  ;;  %565 = vmatpush.msra.mxu3 %v100_v13  ;;  %v22_v30 = vld [vmem:[%s1208_s0 + $0x40] sm:$0xff]  ;;  %v92_v31 = vld [vmem:[%s1207_s1 + $0x18] sm:$0xff]  ;;  %v91_v33 = vld [vmem:[%s1207_s1 + $0x10] sm:$0xff] }
   0xc   :  { %301 = vmatpush.msra.mxu1 %v685_v14  ;;  %v766_v32 = vld [vmem:[%s1207_s1 + $0x98] sm:$0xff]  ;;  %v107_v34 = vld [vmem:[%s1207_s1 + $0x90] sm:$0xff]  ;;  %v90_v35 = vld [vmem:[%s1207_s1 + $0x8] sm:$0xff] }
   0xd   :  { %210 = vmatpush.msra.mxu0 %v99_v15  ;;  %566 = vmatpush.msra.mxu3 %v99_v15  ;;  %v106_v36 = vld [vmem:[%s1207_s1 + $0x88] sm:$0xff]  ;;  %v89_v37 = vld [vmem:[%s1207_s1] sm:$0xff]  ;;  %v68_v39 = vld [vmem:[%s1208_s0 + $0x1b0] sm:$0xff] }
   0xe   :  { %302 = vmatpush.msra.mxu1 %v696_v16  ;;  %v14_v38 = vld [vmem:[%s1208_s0] sm:$0xff]  ;;  %v25_v40 = vld [vmem:[%s1208_s0 + $0x58] sm:$0xff]  ;;  %v15_v42 = vld [vmem:[%s1208_s0 + $0x8] sm:$0xff] }
   0xf   :  { %211 = vmatpush.msra.mxu0 %v98_v17  ;;  %567 = vmatpush.msra.mxu3 %v98_v17  ;;  %v105_v41 = vld [vmem:[%s1207_s1 + $0x80] sm:$0xff]  ;;  %v17_v43 = vld [vmem:[%s1208_s0 + $0x18] sm:$0xff]  ;;  %v71_v44 = vld [vmem:[%s1208_s0 + $0x1c8] sm:$0xff] }
  0x10   :  { %303 = vmatpush.msra.mxu1 %v705_v18  ;;  %v28_v45 = vld [vmem:[%s1208_s0 + $0x70] sm:$0xff]  ;;  %v18_v46 = vld [vmem:[%s1208_s0 + $0x20] sm:$0xff]  ;;  %v31_v49 = vld [vmem:[%s1208_s0 + $0x88] sm:$0xff] }
  0x11   :  { %212 = vmatpush.msra.mxu0 %v97_v19  ;;  %568 = vmatpush.msra.mxu3 %v97_v19  ;;  %v20_v47 = vld [vmem:[%s1208_s0 + $0x30] sm:$0xff]  ;;  %v74_v48 = vld [vmem:[%s1208_s0 + $0x1e0] sm:$0xff]  ;;  %v21_v50 = vld [vmem:[%s1208_s0 + $0x38] sm:$0xff] }
  0x12   :  { %304 = vmatpush.msra.mxu1 %v714_v20  ;;  %537 = vmatmul.msk.f32.gmra.mxu2 %vm129_vm0, %v19_v21  ;;  %v23_v51 = vld [vmem:[%s1208_s0 + $0x48] sm:$0xff]  ;;  %v77_v52 = vld [vmem:[%s1208_s0 + $0x1f8] sm:$0xff]  ;;  %v34_v53 = vld [vmem:[%s1208_s0 + $0xa0] sm:$0xff] }
  0x13   :  { %213 = vmatpush.msra.mxu0 %v96_v22  ;;  %569 = vmatpush.msra.mxu3 %v96_v22  ;;  %v24_v54 = vld [vmem:[%s1208_s0 + $0x50] sm:$0xff]  ;;  %v26_v55 = vld [vmem:[%s1208_s0 + $0x60] sm:$0xff]  ;;  %v37_v57 = vld [vmem:[%s1208_s0 + $0xb8] sm:$0xff] }
  0x14   :  { %305 = vmatpush.msra.mxu1 %v726_v23  ;;  %v80_v56 = vld [vmem:[%s1208_s0 + $0x210] sm:$0xff]  ;;  %v27_v58 = vld [vmem:[%s1208_s0 + $0x68] sm:$0xff]  ;;  %v29_v59 = vld [vmem:[%s1208_s0 + $0x78] sm:$0xff] }
  0x15   :  { %214 = vmatpush.msra.mxu0 %v95_v24  ;;  %570 = vmatpush.msra.mxu3 %v95_v24  ;;  %v83_v60 = vld [vmem:[%s1208_s0 + $0x228] sm:$0xff]  ;;  %v40_v61 = vld [vmem:[%s1208_s0 + $0xd0] sm:$0xff]  ;;  %v30_v62 = vld [vmem:[%s1208_s0 + $0x80] sm:$0xff] }
  0x16   :  { %306 = vmatpush.msra.mxu1 %v736_v25  ;;  %v32_v63 = vld [vmem:[%s1208_s0 + $0x90] sm:$0xff]  ;;  %v86_v0 = vld [vmem:[%s1208_s0 + $0x240] sm:$0xff]  ;;  %v33_v2 = vld [vmem:[%s1208_s0 + $0x98] sm:$0xff] }
  0x17   :  { %215 = vmatpush.msra.mxu0 %v94_v26  ;;  %571 = vmatpush.msra.mxu3 %v94_v26  ;;  %v46_v5 = vld [vmem:[%s1208_s0 + $0x100] sm:$0xff]  ;;  %v49_v9 = vld [vmem:[%s1208_s0 + $0x118] sm:$0xff]  ;;  %v75_v12 = vld [vmem:[%s1208_s0 + $0x1e8] sm:$0xff] }
  0x18   :  { %307 = vmatpush.msra.mxu1 %v745_v27  ;;  %v52_v13 = vld [vmem:[%s1208_s0 + $0x130] sm:$0xff]  ;;  %v55_v17 = vld [vmem:[%s1208_s0 + $0x148] sm:$0xff]  ;;  %v58_v21 = vld [vmem:[%s1208_s0 + $0x160] sm:$0xff] }
  0x19   :  { %216 = vmatpush.msra.mxu0 %v93_v28  ;;  %572 = vmatpush.msra.mxu3 %v93_v28  ;;  %v44_v15 = vld [vmem:[%s1208_s0 + $0xf0] sm:$0xff]  ;;  %v47_v19 = vld [vmem:[%s1208_s0 + $0x108] sm:$0xff] }
  0x1a   :  { %308 = vmatpush.msra.mxu1 %v754_v29  ;;  %538 = vmatmul.msk.f32.gmra.mxu2 %vm129_vm0, %v22_v30  ;;  %v48_v22 = vld [vmem:[%s1208_s0 + $0x110] sm:$0xff]  ;;  %v51_v26 = vld [vmem:[%s1208_s0 + $0x128] sm:$0xff]  ;;  %v54_v30 = vld [vmem:[%s1208_s0 + $0x140] sm:$0xff] }
  0x1b   :  { %217 = vmatpush.msra.mxu0 %v92_v31  ;;  %573 = vmatpush.msra.mxu3 %v92_v31  ;;  %v84_v24 = vld [vmem:[%s1208_s0 + $0x230] sm:$0xff]  ;;  %v87_v28 = vld [vmem:[%s1208_s0 + $0x248] sm:$0xff] }
  0x1c   :  { %309 = vmatpush.msra.mxu1 %v766_v32 }
  0x1d   :  { %218 = vmatpush.msra.mxu0 %v91_v33  ;;  %574 = vmatpush.msra.mxu3 %v91_v33  ;;  %v67_v33 = vld [vmem:[%s1208_s0 + $0x1a8] sm:$0xff] }
  0x1e   :  { %310 = vmatpush.msra.mxu1 %v107_v34 }
  0x1f   :  { %219 = vmatpush.msra.mxu0 %v90_v35  ;;  %575 = vmatpush.msra.mxu3 %v90_v35  ;;  %v57_v35 = vld [vmem:[%s1208_s0 + $0x158] sm:$0xff] }
  0x20   :  { %311 = vmatpush.msra.mxu1 %v106_v36 }
  0x21   :  { %220 = vmatpush.msra.mxu0 %v89_v37  ;;  %576 = vmatpush.msra.mxu3 %v89_v37  ;;  %v59_v37 = vld [vmem:[%s1208_s0 + $0x168] sm:$0xff] }
  0x22   :  { %221 = vmatmul.f32.vlgmr.msra.gmra.mxu0 %v14_v38  ;;  %275 = vmatmul.f32.vlgmr.msra.gmra.mxu3 %v68_v39  ;;  %v70_v38 = vld [vmem:[%s1208_s0 + $0x1c0] sm:$0xff] }
  0x23   :  { %539 = vmatmul.msk.f32.gmra.mxu2 %vm129_vm0, %v25_v40  ;;  %577 = vmatpush.msrb.mxu3 %v632_v3  ;;  %v35_v3 = vld [vmem:[%s1208_s0 + $0xa8] sm:$0xff]  ;;  %v82_v39 = vld [vmem:[%s1208_s0 + $0x220] sm:$0xff]  ;;  %v60_v40 = vld [vmem:[%s1208_s0 + $0x170] sm:$0xff] }
  0x24   :  { %312 = vmatpush.msra.mxu1 %v105_v41 }
  0x25   :  { %313 = vmatmul.f32.vlgmr.msra.gmra.mxu1 %v15_v42  ;;  %578 = vmatpush.msrb.mxu3 %v647_v6  ;;  %v36_v6 = vld [vmem:[%s1208_s0 + $0xb0] sm:$0xff] }
  0x27   :  { %579 = vmatpush.msrb.mxu3 %v657_v8  ;;  %v72_v8 = vld [vmem:[%s1208_s0 + $0x1d0] sm:$0xff] }
  0x29   :  { %580 = vmatpush.msrb.mxu3 %v672_v11  ;;  %v41_v11 = vld [vmem:[%s1208_s0 + $0xd8] sm:$0xff] }
  0x2a   :  { %224 = vmatmul.f32.gmra.mxu0 %v17_v43  ;;  %278 = vmatmul.f32.gmra.mxu3 %v71_v44  ;;  %v62_v44 = vld [vmem:[%s1208_s0 + $0x180] sm:$0xff] }
  0x2b   :  { %540 = vmatmul.msk.f32.gmra.mxu2 %vm129_vm0, %v28_v45  ;;  %581 = vmatpush.msrb.mxu3 %v685_v14  ;;  %v42_v14 = vld [vmem:[%s1208_s0 + $0xe0] sm:$0xff] }
  0x2d   :  { %316 = vmatmul.f32.gmra.mxu1 %v18_v46  ;;  %582 = vmatpush.msrb.mxu3 %v696_v16  ;;  %v78_v16 = vld [vmem:[%s1208_s0 + $0x200] sm:$0xff]  ;;  %v73_v46 = vld [vmem:[%s1208_s0 + $0x1d8] sm:$0xff] }
  0x2f   :  { %583 = vmatpush.msrb.mxu3 %v705_v18  ;;  %v45_v18 = vld [vmem:[%s1208_s0 + $0xf8] sm:$0xff] }
  0x31   :  { %584 = vmatpush.msrb.mxu3 %v714_v20  ;;  %v81_v20 = vld [vmem:[%s1208_s0 + $0x218] sm:$0xff] }
  0x32   :  { %227 = vmatmul.f32.gmra.mxu0 %v20_v47  ;;  %281 = vmatmul.f32.gmra.mxu3 %v74_v48  ;;  %v85_v47 = vld [vmem:[%s1208_s0 + $0x238] sm:$0xff] }
  0x33   :  { %541 = vmatmul.msk.f32.gmra.mxu2 %vm129_vm0, %v31_v49  ;;  %585 = vmatpush.msrb.mxu3 %v726_v23  ;;  %v50_v23 = vld [vmem:[%s1208_s0 + $0x120] sm:$0xff]  ;;  %v63_v49 = vld [vmem:[%s1208_s0 + $0x188] sm:$0xff] }
  0x35   :  { %319 = vmatmul.f32.gmra.mxu1 %v21_v50  ;;  %586 = vmatpush.msrb.mxu3 %v736_v25  ;;  %v61_v25 = vld [vmem:[%s1208_s0 + $0x178] sm:$0xff] }
  0x37   :  { %587 = vmatpush.msrb.mxu3 %v745_v27  ;;  %v53_v27 = vld [vmem:[%s1208_s0 + $0x138] sm:$0xff] }
  0x39   :  { %588 = vmatpush.msrb.mxu3 %v754_v29  ;;  %v64_v29 = vld [vmem:[%s1208_s0 + $0x190] sm:$0xff] }
  0x3a   :  { %230 = vmatmul.f32.gmra.mxu0 %v23_v51  ;;  %284 = vmatmul.f32.gmra.mxu3 %v77_v52 }
  0x3b   :  { %542 = vmatmul.msk.f32.gmra.mxu2 %vm129_vm0, %v34_v53  ;;  %589 = vmatpush.msrb.mxu3 %v766_v32  ;;  %v56_v32 = vld [vmem:[%s1208_s0 + $0x150] sm:$0xff] }
  0x3d   :  { %322 = vmatmul.f32.gmra.mxu1 %v24_v54  ;;  %590 = vmatpush.msrb.mxu3 %v107_v34  ;;  %v79_v34 = vld [vmem:[%s1208_s0 + $0x208] sm:$0xff] }
  0x3f   :  { %591 = vmatpush.msrb.mxu3 %v106_v36 }
  0x41   :  { %592 = vmatpush.msrb.mxu3 %v105_v41  ;;  %v1019_v41 = vld [vmem:[%s1209_s2] ss:$0 sm:$0xff] }
  0x42   :  { %233 = vmatmul.f32.gmra.mxu0 %v26_v55  ;;  %287 = vmatmul.f32.gmra.mxu3 %v80_v56  ;;  %v65_v56 = vld [vmem:[%s1208_s0 + $0x198] sm:$0xff] }
  0x43   :  { %543 = vmatmul.msk.f32.gmra.mxu2 %vm129_vm0, %v37_v57  ;;  %593 = vmatpush.msra.mxu3 %v624_v1  ;;  %v43_v1 = vld [vmem:[%s1208_s0 + $0xe8] sm:$0xff] }
  0x45   :  { %325 = vmatmul.f32.gmra.mxu1 %v27_v58  ;;  %594 = vmatpush.msra.mxu3 %v637_v4  ;;  %v69_v4 = vld [vmem:[%s1208_s0 + $0x1b8] sm:$0xff]  ;;  %v76_v58 = vld [vmem:[%s1208_s0 + $0x1f0] sm:$0xff] }
  0x47   :  { %595 = vmatpush.msra.mxu3 %v652_v7  ;;  %v38_v7 = vld [vmem:[%s1208_s0 + $0xc0] sm:$0xff] }
  0x49   :  { %596 = vmatpush.msra.mxu3 %v667_v10  ;;  %v39_v10 = vld [vmem:[%s1208_s0 + $0xc8] sm:$0xff] }
  0x4a   :  { %236 = vmatmul.f32.gmra.mxu0 %v29_v59  ;;  %290 = vmatmul.f32.gmra.mxu3 %v83_v60  ;;  %v88_v59 = vld [vmem:[%s1208_s0 + $0x250] sm:$0xff] }
  0x4b   :  { %544 = vmatmul.msk.f32.gmra.mxu2 %vm129_vm0, %v40_v61  ;;  %v66_v61 = vld [vmem:[%s1208_s0 + $0x1a0] sm:$0xff] }
  0x4d   :  { %328 = vmatmul.f32.gmra.mxu1 %v30_v62 }
  0x52   :  { %239 = vmatmul.f32.gmra.mxu0 %v32_v63  ;;  %293 = vmatmul.f32.gmra.mxu3 %v86_v0 }
  0x53   :  { %545 = vmatmul.msk.f32.gmra.mxu2 %vm129_vm0, %v43_v1 }
  0x55   :  { %331 = vmatmul.f32.gmra.mxu1 %v33_v2 }
  0x5a   :  { %242 = vmatmul.f32.gmra.mxu0 %v35_v3  ;;  %367 = vmatmul.f32.vlgmr.msrb.gmra.mxu3 %v69_v4 }
  0x5b   :  { %546 = vmatmul.msk.f32.gmra.mxu2 %vm129_vm0, %v46_v5 }
  0x5d   :  { %334 = vmatmul.f32.gmra.mxu1 %v36_v6 }
  0x62   :  { %245 = vmatmul.f32.gmra.mxu0 %v38_v7  ;;  %370 = vmatmul.f32.gmra.mxu3 %v72_v8 }
  0x63   :  { %547 = vmatmul.msk.f32.gmra.mxu2 %vm129_vm0, %v49_v9 }
  0x65   :  { %337 = vmatmul.f32.gmra.mxu1 %v39_v10 }
  0x6a   :  { %248 = vmatmul.f32.gmra.mxu0 %v41_v11  ;;  %373 = vmatmul.f32.gmra.mxu3 %v75_v12 }
  0x6b   :  { %548 = vmatmul.msk.f32.gmra.mxu2 %vm129_vm0, %v52_v13 }
  0x6d   :  { %340 = vmatmul.f32.gmra.mxu1 %v42_v14 }
  0x72   :  { %251 = vmatmul.f32.gmra.mxu0 %v44_v15  ;;  %376 = vmatmul.f32.gmra.mxu3 %v78_v16 }
  0x73   :  { %549 = vmatmul.msk.f32.gmra.mxu2 %vm129_vm0, %v55_v17 }
  0x75   :  { %343 = vmatmul.f32.gmra.mxu1 %v45_v18 }
  0x7a   :  { %254 = vmatmul.f32.gmra.mxu0 %v47_v19  ;;  %379 = vmatmul.f32.gmra.mxu3 %v81_v20 }
  0x7b   :  { %550 = vmatmul.msk.f32.gmra.mxu2 %vm129_vm0, %v58_v21 }
  0x7d   :  { %346 = vmatmul.f32.gmra.mxu1 %v48_v22 }
  0x82   :  { %257 = vmatmul.f32.gmra.mxu0 %v50_v23  ;;  %382 = vmatmul.f32.gmra.mxu3 %v84_v24 }
  0x83   :  { %551 = vmatmul.msk.f32.gmra.mxu2 %vm129_vm0, %v61_v25 }
  0x85   :  { %349 = vmatmul.f32.gmra.mxu1 %v51_v26 }
  0x8a   :  { %260 = vmatmul.f32.gmra.mxu0 %v53_v27  ;;  %385 = vmatmul.f32.gmra.mxu3 %v87_v28 }
  0x8b   :  { %552 = vmatmul.msk.f32.gmra.mxu2 %vm129_vm0, %v64_v29 }
  0x8d   :  { %352 = vmatmul.f32.gmra.mxu1 %v54_v30  ;;  %v406_v31 = vpop.f32.mrf.mxu2 }
  0x92   :  { %263 = vmatmul.f32.gmra.mxu0 %v56_v32  ;;  %557 = vmatmul.msk.f32.vlgmr.msra.gmra.mxu3 %vm129_vm0, %v79_v34 }
  0x93   :  { %553 = vmatmul.msk.f32.gmra.mxu2 %vm129_vm0, %v67_v33 }
  0x95   :  { %355 = vmatmul.f32.gmra.mxu1 %v57_v35  ;;  %v409_v36 = vpop.f32.mrf.mxu2 }
  0x9a   :  { %266 = vmatmul.f32.gmra.mxu0 %v59_v37  ;;  %558 = vmatmul.msk.f32.gmra.mxu3 %vm129_vm0, %v82_v39 }
  0x9b   :  { %554 = vmatmul.msk.f32.gmra.mxu2 %vm129_vm0, %v70_v38 }
  0x9d   :  { %358 = vmatmul.f32.gmra.mxu1 %v60_v40  ;;  %v412_v42 = vpop.f32.mrf.mxu2 }
  0x9f   :  { %v222_v43 = vpop.f32.mrf.mxu0 }
  0xa0   :  { %v223_v45 = vadd.f32 %v1019_v41, %v222_v43 }
  0xa2   :  { %v314_v48 = vpop.f32.mrf.mxu1  ;;  %269 = vmatmul.f32.gmra.mxu0 %v62_v44  ;;  %559 = vmatmul.msk.f32.gmra.mxu3 %vm129_vm0, %v85_v47 }
  0xa3   :  { %v315_v50 = vadd.f32 %v314_v48, %v223_v45  ;;  %555 = vmatmul.msk.f32.gmra.mxu2 %vm129_vm0, %v73_v46 }
  0xa5   :  { %v407_v51 = vadd.f32 %v406_v31, %v315_v50  ;;  %361 = vmatmul.f32.gmra.mxu1 %v63_v49  ;;  %v1036_v52 = vpop.f32.mrf.mxu3 }
  0xa6   :  { %v415_v53 = vpop.f32.mrf.mxu2 }
  0xa7   :  { %v481_v54 = vmax.f32 %v407_v51, 0.0  ;;  %v225_v55 = vpop.f32.mrf.mxu0 }
  0xa8   :  { %v226_v57 = vadd.f32 %v1019_v41, %v225_v55 }
  0xa9   :  { %507 = vst.msk [vmem:[%s1210_s3] sm:$0xff] %vm506_vm1, %v481_v54 }
  0xaa   :  { %v317_v60 = vpop.f32.mrf.mxu1  ;;  %272 = vmatmul.f32.gmra.mxu0 %v65_v56  ;;  %560 = vmatmul.msk.f32.gmra.mxu3 %vm129_vm0, %v88_v59 }
  0xab   :  { %v318_v62 = vadd.f32 %v317_v60, %v226_v57  ;;  %556 = vmatmul.msk.f32.gmra.mxu2 %vm129_vm0, %v76_v58 }
  0xad   :  { %v410_v63 = vadd.f32 %v409_v36, %v318_v62  ;;  %364 = vmatmul.f32.gmra.mxu1 %v66_v61  ;;  %v1057_v0 = vpop.f32.mrf.mxu3 }
  0xae   :  { %v418_v1 = vpop.f32.mrf.mxu2 }
  0xaf   :  { %v482_v2 = vmax.f32 %v410_v63, 0.0  ;;  %v228_v3 = vpop.f32.mrf.mxu0 }
  0xb0   :  { %v229_v4 = vadd.f32 %v1019_v41, %v228_v3 }
  0xb1   :  { %508 = vst.msk [vmem:[%s1210_s3 + $0x8] sm:$0xff] %vm506_vm1, %v482_v2 }
  0xb2   :  { %v320_v5 = vpop.f32.mrf.mxu1 }
  0xb3   :  { %v321_v6 = vadd.f32 %v320_v5, %v229_v4 }
  0xb5   :  { %v413_v7 = vadd.f32 %v412_v42, %v321_v6  ;;  %v1064_v8 = vpop.f32.mrf.mxu3 }
  0xb6   :  { %v421_v9 = vpop.f32.mrf.mxu2 }
  0xb7   :  { %v483_v10 = vmax.f32 %v413_v7, 0.0  ;;  %v231_v11 = vpop.f32.mrf.mxu0 }
  0xb8   :  { %v232_v12 = vadd.f32 %v1019_v41, %v231_v11 }
  0xb9   :  { %509 = vst.msk [vmem:[%s1210_s3 + $0x10] sm:$0xff] %vm506_vm1, %v483_v10 }
  0xba   :  { %v323_v13 = vpop.f32.mrf.mxu1 }
  0xbb   :  { %v324_v14 = vadd.f32 %v323_v13, %v232_v12 }
  0xbd   :  { %v416_v15 = vadd.f32 %v415_v53, %v324_v14  ;;  %v1071_v16 = vpop.f32.mrf.mxu3 }
  0xbe   :  { %v424_v17 = vpop.f32.mrf.mxu2 }
  0xbf   :  { %v484_v18 = vmax.f32 %v416_v15, 0.0  ;;  %v234_v19 = vpop.f32.mrf.mxu0 }
  0xc0   :  { %v235_v20 = vadd.f32 %v1019_v41, %v234_v19 }
  0xc1   :  { %510 = vst.msk [vmem:[%s1210_s3 + $0x18] sm:$0xff] %vm506_vm1, %v484_v18 }
  0xc2   :  { %v326_v21 = vpop.f32.mrf.mxu1 }
  0xc3   :  { %v327_v22 = vadd.f32 %v326_v21, %v235_v20 }
  0xc5   :  { %v419_v23 = vadd.f32 %v418_v1, %v327_v22  ;;  %v1078_v24 = vpop.f32.mrf.mxu3 }
  0xc6   :  { %v427_v25 = vpop.f32.mrf.mxu2 }
  0xc7   :  { %v485_v26 = vmax.f32 %v419_v23, 0.0  ;;  %v237_v27 = vpop.f32.mrf.mxu0 }
  0xc8   :  { %v238_v28 = vadd.f32 %v1019_v41, %v237_v27 }
  0xc9   :  { %511 = vst.msk [vmem:[%s1210_s3 + $0x20] sm:$0xff] %vm506_vm1, %v485_v26 }
  0xca   :  { %v329_v29 = vpop.f32.mrf.mxu1 }
  0xcb   :  { %v330_v30 = vadd.f32 %v329_v29, %v238_v28 }
  0xcd   :  { %v422_v31 = vadd.f32 %v421_v9, %v330_v30  ;;  %v1085_v32 = vpop.f32.mrf.mxu3 }
  0xce   :  { %v430_v33 = vpop.f32.mrf.mxu2 }
  0xcf   :  { %v486_v34 = vmax.f32 %v422_v31, 0.0  ;;  %v240_v35 = vpop.f32.mrf.mxu0 }
  0xd0   :  { %v241_v36 = vadd.f32 %v1019_v41, %v240_v35 }
  0xd1   :  { %512 = vst.msk [vmem:[%s1210_s3 + $0x28] sm:$0xff] %vm506_vm1, %v486_v34 }
  0xd2   :  { %v332_v37 = vpop.f32.mrf.mxu1 }
  0xd3   :  { %v333_v38 = vadd.f32 %v332_v37, %v241_v36 }
  0xd5   :  { %v425_v39 = vadd.f32 %v424_v17, %v333_v38  ;;  %v1092_v40 = vpop.f32.mrf.mxu3 }
  0xd6   :  { %v433_v42 = vpop.f32.mrf.mxu2 }
  0xd7   :  { %v487_v43 = vmax.f32 %v425_v39, 0.0  ;;  %v243_v44 = vpop.f32.mrf.mxu0 }
  0xd8   :  { %v244_v45 = vadd.f32 %v1019_v41, %v243_v44 }
  0xd9   :  { %513 = vst.msk [vmem:[%s1210_s3 + $0x30] sm:$0xff] %vm506_vm1, %v487_v43 }
  0xda   :  { %v335_v46 = vpop.f32.mrf.mxu1 }
  0xdb   :  { %v336_v47 = vadd.f32 %v335_v46, %v244_v45 }
  0xdd   :  { %v428_v48 = vadd.f32 %v427_v25, %v336_v47  ;;  %v1099_v49 = vpop.f32.mrf.mxu3  ;;  %v286_v47 = vadd.f32 %v1019_v41, %v1071_v16  ;;  %v277_v16 = vadd.f32 %v1019_v41, %v1036_v52 }
  0xde   :  { %v436_v50 = vpop.f32.mrf.mxu2 }
  0xdf   :  { %v488_v51 = vmax.f32 %v428_v48, 0.0  ;;  %v246_v53 = vpop.f32.mrf.mxu0 }
  0xe0   :  { %v247_v54 = vadd.f32 %v1019_v41, %v246_v53 }
  0xe1   :  { %514 = vst.msk [vmem:[%s1210_s3 + $0x38] sm:$0xff] %vm506_vm1, %v488_v51 }
  0xe2   :  { %v338_v55 = vpop.f32.mrf.mxu1 }
  0xe3   :  { %v339_v56 = vadd.f32 %v338_v55, %v247_v54 }
  0xe5   :  { %v431_v57 = vadd.f32 %v430_v33, %v339_v56  ;;  %v1106_v58 = vpop.f32.mrf.mxu3 }
  0xe6   :  { %v439_v59 = vpop.f32.mrf.mxu2 }
  0xe7   :  { %v489_v60 = vmax.f32 %v431_v57, 0.0  ;;  %v249_v61 = vpop.f32.mrf.mxu0 }
  0xe8   :  { %v250_v62 = vadd.f32 %v1019_v41, %v249_v61 }
  0xe9   :  { %515 = vst.msk [vmem:[%s1210_s3 + $0x40] sm:$0xff] %vm506_vm1, %v489_v60 }
  0xea   :  { %v341_v63 = vpop.f32.mrf.mxu1 }
  0xeb   :  { %v342_v1 = vadd.f32 %v341_v63, %v250_v62  ;;  %v289_v62 = vadd.f32 %v1019_v41, %v1078_v24 }
  0xed   :  { %v434_v2 = vadd.f32 %v433_v42, %v342_v1  ;;  %v1113_v3 = vpop.f32.mrf.mxu3  ;;  %v369_v1 = vadd.f32 %v1099_v49, %v277_v16  ;;  %v280_v49 = vadd.f32 %v1019_v41, %v1057_v0 }
  0xee   :  { %v442_v4 = vpop.f32.mrf.mxu2 }
  0xef   :  { %v490_v5 = vmax.f32 %v434_v2, 0.0  ;;  %v252_v6 = vpop.f32.mrf.mxu0 }
  0xf0   :  { %v253_v7 = vadd.f32 %v1019_v41, %v252_v6 }
  0xf1   :  { %516 = vst.msk [vmem:[%s1210_s3 + $0x48] sm:$0xff] %vm506_vm1, %v490_v5 }
  0xf2   :  { %v344_v9 = vpop.f32.mrf.mxu1 }
  0xf3   :  { %v345_v10 = vadd.f32 %v344_v9, %v253_v7 }
  0xf5   :  { %v437_v11 = vadd.f32 %v436_v50, %v345_v10  ;;  %v377_v12 = vpop.f32.mrf.mxu3 }
  0xf6   :  { %v445_v13 = vpop.f32.mrf.mxu2  ;;  %v378_v50 = vadd.f32 %v377_v12, %v286_v47 }
  0xf7   :  { %v491_v14 = vmax.f32 %v437_v11, 0.0  ;;  %v255_v15 = vpop.f32.mrf.mxu0 }
  0xf8   :  { %v256_v17 = vadd.f32 %v1019_v41, %v255_v15 }
  0xf9   :  { %517 = vst.msk [vmem:[%s1210_s3 + $0x50] sm:$0xff] %vm506_vm1, %v491_v14  ;;  %v292_v14 = vadd.f32 %v1019_v41, %v1085_v32 }
  0xfa   :  { %v347_v18 = vpop.f32.mrf.mxu1 }
  0xfb   :  { %v348_v19 = vadd.f32 %v347_v18, %v256_v17  ;;  %v372_v17 = vadd.f32 %v1106_v58, %v280_v49  ;;  %v283_v58 = vadd.f32 %v1019_v41, %v1064_v8 }
  0xfd   :  { %v440_v20 = vadd.f32 %v439_v59, %v348_v19  ;;  %v380_v21 = vpop.f32.mrf.mxu3 }
  0xfe   :  { %v448_v22 = vpop.f32.mrf.mxu2  ;;  %v381_v2 = vadd.f32 %v380_v21, %v289_v62 }
  0xff   :  { %v492_v23 = vmax.f32 %v440_v20, 0.0  ;;  %v258_v25 = vpop.f32.mrf.mxu0 }
 0x100   :  { %v259_v26 = vadd.f32 %v1019_v41, %v258_v25 }
 0x101   :  { %518 = vst.msk [vmem:[%s1210_s3 + $0x58] sm:$0xff] %vm506_vm1, %v492_v23 }
 0x102   :  { %v350_v27 = vpop.f32.mrf.mxu1 }
 0x103   :  { %v351_v28 = vadd.f32 %v350_v27, %v259_v26 }
 0x105   :  { %v443_v29 = vadd.f32 %v442_v4, %v351_v28  ;;  %v383_v30 = vpop.f32.mrf.mxu3 }
 0x106   :  { %v451_v31 = vpop.f32.mrf.mxu2  ;;  %v384_v18 = vadd.f32 %v383_v30, %v292_v14 }
 0x107   :  { %v493_v33 = vmax.f32 %v443_v29, 0.0  ;;  %v261_v34 = vpop.f32.mrf.mxu0  ;;  %v295_v29 = vadd.f32 %v1019_v41, %v1092_v40 }
 0x108   :  { %v262_v35 = vadd.f32 %v1019_v41, %v261_v34 }
 0x109   :  { %519 = vst.msk [vmem:[%s1210_s3 + $0x60] sm:$0xff] %vm506_vm1, %v493_v33 }
 0x10a   :  { %v353_v36 = vpop.f32.mrf.mxu1 }
 0x10b   :  { %v354_v37 = vadd.f32 %v353_v36, %v262_v35 }
 0x10d   :  { %v446_v38 = vadd.f32 %v445_v13, %v354_v37  ;;  %v1135_v39 = vpop.f32.mrf.mxu3 }
 0x10e   :  { %v454_v42 = vpop.f32.mrf.mxu2  ;;  %v387_v33 = vadd.f32 %v1135_v39, %v295_v29 }
 0x10f   :  { %v494_v43 = vmax.f32 %v446_v38, 0.0  ;;  %v264_v44 = vpop.f32.mrf.mxu0 }
 0x110   :  { %v265_v45 = vadd.f32 %v1019_v41, %v264_v44 }
 0x111   :  { %520 = vst.msk [vmem:[%s1210_s3 + $0x68] sm:$0xff] %vm506_vm1, %v494_v43 }
 0x112   :  { %v356_v46 = vpop.f32.mrf.mxu1 }
 0x113   :  { %v357_v48 = vadd.f32 %v356_v46, %v265_v45 }
 0x115   :  { %v449_v51 = vadd.f32 %v448_v22, %v357_v48  ;;  %v469_v54 = vpop.f32.mrf.mxu3 }
 0x116   :  { %v457_v53 = vpop.f32.mrf.mxu2  ;;  %v470_v56 = vadd.f32 %v469_v54, %v378_v50 }
 0x117   :  { %v495_v55 = vmax.f32 %v449_v51, 0.0  ;;  %v267_v57 = vpop.f32.mrf.mxu0 }
 0x118   :  { %v268_v59 = vadd.f32 %v1019_v41, %v267_v57  ;;  %v502_v60 = vmax.f32 %v470_v56, 0.0 }
 0x119   :  { %521 = vst.msk [vmem:[%s1210_s3 + $0x70] sm:$0xff] %vm506_vm1, %v495_v55 }
 0x11a   :  { %v359_v61 = vpop.f32.mrf.mxu1  ;;  %528 = vst.msk [vmem:[%s1210_s3 + $0xa8] sm:$0xff] %vm506_vm1, %v502_v60 }
 0x11b   :  { %v360_v63 = vadd.f32 %v359_v61, %v268_v59 }
 0x11d   :  { %v452_v4 = vadd.f32 %v451_v31, %v360_v63  ;;  %v472_v6 = vpop.f32.mrf.mxu3  ;;  %v375_v31 = vadd.f32 %v1113_v3, %v283_v58 }
 0x11e   :  { %v460_v5 = vpop.f32.mrf.mxu2  ;;  %v473_v10 = vadd.f32 %v472_v6, %v381_v2 }
 0x11f   :  { %v496_v7 = vmax.f32 %v452_v4, 0.0  ;;  %v461_v9 = vadd.f32 %v460_v5, %v369_v1  ;;  %v270_v11 = vpop.f32.mrf.mxu0 }
 0x120   :  { %v271_v52 = vadd.f32 %v1019_v41, %v270_v11  ;;  %v503_v12 = vmax.f32 %v473_v10, 0.0 }
 0x121   :  { %522 = vst.msk [vmem:[%s1210_s3 + $0x78] sm:$0xff] %vm506_vm1, %v496_v7  ;;  %v499_v24 = vmax.f32 %v461_v9, 0.0 }
 0x122   :  { %v362_v13 = vpop.f32.mrf.mxu1  ;;  %529 = vst.msk [vmem:[%s1210_s3 + $0xb0] sm:$0xff] %vm506_vm1, %v503_v12 }
 0x123   :  { %525 = vst.msk [vmem:[%s1210_s3 + $0x90] sm:$0xff] %vm506_vm1, %v499_v24  ;;  %v363_v15 = vadd.f32 %v362_v13, %v271_v52 }
 0x125   :  { %v455_v19 = vadd.f32 %v454_v42, %v363_v15  ;;  %v475_v0 = vpop.f32.mrf.mxu3 }
 0x126   :  { %v463_v20 = vpop.f32.mrf.mxu2  ;;  %v476_v32 = vadd.f32 %v475_v0, %v384_v18 }
 0x127   :  { %v497_v21 = vmax.f32 %v455_v19, 0.0  ;;  %v464_v22 = vadd.f32 %v463_v20, %v372_v17  ;;  %v273_v23 = vpop.f32.mrf.mxu0 }
 0x128   :  { %v274_v25 = vadd.f32 %v1019_v41, %v273_v23  ;;  %v504_v27 = vmax.f32 %v476_v32, 0.0 }
 0x129   :  { %523 = vst.msk [vmem:[%s1210_s3 + $0x80] sm:$0xff] %vm506_vm1, %v497_v21  ;;  %v500_v26 = vmax.f32 %v464_v22, 0.0 }
 0x12a   :  { %v365_v28 = vpop.f32.mrf.mxu1  ;;  %530 = vst.msk [vmem:[%s1210_s3 + $0xb8] sm:$0xff] %vm506_vm1, %v504_v27 }
 0x12b   :  { %526 = vst.msk [vmem:[%s1210_s3 + $0x98] sm:$0xff] %vm506_vm1, %v500_v26  ;;  %v366_v30 = vadd.f32 %v365_v28, %v274_v25 }
 0x12d   :  { %v458_v34 = vadd.f32 %v457_v53, %v366_v30  ;;  %v478_v35 = vpop.f32.mrf.mxu3 }
 0x12e   :  { %v466_v8 = vpop.f32.mrf.mxu2  ;;  %v479_v40 = vadd.f32 %v478_v35, %v387_v33 }
 0x12f   :  { %v498_v36 = vmax.f32 %v458_v34, 0.0  ;;  %v467_v41 = vadd.f32 %v466_v8, %v375_v31 }
 0x130   :  { %v505_v38 = vmax.f32 %v479_v40, 0.0 }
 0x131   :  { %524 = vst.msk [vmem:[%s1210_s3 + $0x88] sm:$0xff] %vm506_vm1, %v498_v36  ;;  %v501_v37 = vmax.f32 %v467_v41, 0.0 }
 0x132   :  { %531 = vst.msk [vmem:[%s1210_s3 + $0xc0] sm:$0xff] %vm506_vm1, %v505_v38 }
 0x133   :  { %527 = vst.msk [vmem:[%s1210_s3 + $0xa0] sm:$0xff] %vm506_vm1, %v501_v37 }

// kernel: simpleconv_forward.5
= control target key start
LH: loop header
LB: loop body
LE: loop exit
PB: predicated region body
PF: predicated region fallthrough
CT: control target
= control target key end

     0   :  { %s1336_s0 = inlined_call_operand.vmem [shape: f32[2,1600], index: 0, kind: input, shape index: {}]   ;;  %s1337_s1 = inlined_call_operand.vmem [shape: f32[1600,128], index: 1, kind: input, shape index: {}]   ;;  %s1338_s2 = inlined_call_operand.vmem [shape: f32[1,128], index: 2, kind: input, shape index: {}]   ;;  %s1339_s3 = inlined_call_operand.vmem [shape: f32[128,10], index: 3, kind: input, shape index: {}]   ;;  %s1340_s4 = inlined_call_operand.vmem [shape: f32[1,10], index: 4, kind: input, shape index: {}]   ;;  %s1341_s5 = inlined_call_operand.hbm [shape: f32[2,10], index: 5, kind: output, shape index: {}]  }
   0x1   :  { %v40_v0 = vld [vmem:[%s1337_s1 + $0x78] sm:$0xff]  ;;  %v39_v2 = vld [vmem:[%s1337_s1 + $0x70] sm:$0xff]  ;;  %v38_v6 = vld [vmem:[%s1337_s1 + $0x68] sm:$0xff] }
   0x2   :  { %v72_v1 = vld [vmem:[%s1337_s1 + $0x178] sm:$0xff]  ;;  %266 = vmatpush.msra.mxu0 %v40_v0  ;;  %v71_v4 = vld [vmem:[%s1337_s1 + $0x170] sm:$0xff]  ;;  %v70_v8 = vld [vmem:[%s1337_s1 + $0x168] sm:$0xff] }
   0x3   :  { %306 = vmatpush.msra.mxu2 %v72_v1  ;;  %v56_v3 = vld [vmem:[%s1337_s1 + $0xf8] sm:$0xff]  ;;  %v55_v7 = vld [vmem:[%s1337_s1 + $0xf0] sm:$0xff]  ;;  %v54_v10 = vld [vmem:[%s1337_s1 + $0xe8] sm:$0xff] }
   0x4   :  { %v88_v5 = vld [vmem:[%s1337_s1 + $0x1f8] sm:$0xff]  ;;  %286 = vmatpush.msra.mxu1 %v56_v3  ;;  %267 = vmatpush.msra.mxu0 %v39_v2  ;;  %v87_v9 = vld [vmem:[%s1337_s1 + $0x1f0] sm:$0xff]  ;;  %v37_v11 = vld [vmem:[%s1337_s1 + $0x60] sm:$0xff] }
   0x5   :  { %326 = vmatpush.msra.mxu3 %v88_v5  ;;  %307 = vmatpush.msra.mxu2 %v71_v4  ;;  %v69_v12 = vld [vmem:[%s1337_s1 + $0x160] sm:$0xff]  ;;  %v86_v13 = vld [vmem:[%s1337_s1 + $0x1e8] sm:$0xff]  ;;  %v36_v16 = vld [vmem:[%s1337_s1 + $0x58] sm:$0xff] }
   0x6   :  { %287 = vmatpush.msra.mxu1 %v55_v7  ;;  %268 = vmatpush.msra.mxu0 %v38_v6  ;;  %v53_v14 = vld [vmem:[%s1337_s1 + $0xe0] sm:$0xff]  ;;  %v68_v17 = vld [vmem:[%s1337_s1 + $0x158] sm:$0xff]  ;;  %v35_v20 = vld [vmem:[%s1337_s1 + $0x50] sm:$0xff] }
   0x7   :  { %327 = vmatpush.msra.mxu3 %v87_v9  ;;  %308 = vmatpush.msra.mxu2 %v70_v8  ;;  %v85_v15 = vld [vmem:[%s1337_s1 + $0x1e0] sm:$0xff]  ;;  %v52_v18 = vld [vmem:[%s1337_s1 + $0xd8] sm:$0xff]  ;;  %v67_v21 = vld [vmem:[%s1337_s1 + $0x150] sm:$0xff] }
   0x8   :  { %288 = vmatpush.msra.mxu1 %v54_v10  ;;  %269 = vmatpush.msra.mxu0 %v37_v11  ;;  %v84_v19 = vld [vmem:[%s1337_s1 + $0x1d8] sm:$0xff]  ;;  %v51_v22 = vld [vmem:[%s1337_s1 + $0xd0] sm:$0xff]  ;;  %v34_v24 = vld [vmem:[%s1337_s1 + $0x48] sm:$0xff] }
   0x9   :  { %328 = vmatpush.msra.mxu3 %v86_v13  ;;  %309 = vmatpush.msra.mxu2 %v69_v12  ;;  %v83_v23 = vld [vmem:[%s1337_s1 + $0x1d0] sm:$0xff]  ;;  %v66_v25 = vld [vmem:[%s1337_s1 + $0x148] sm:$0xff]  ;;  %v33_v28 = vld [vmem:[%s1337_s1 + $0x40] sm:$0xff] }
   0xa   :  { %289 = vmatpush.msra.mxu1 %v53_v14  ;;  %270 = vmatpush.msra.mxu0 %v36_v16  ;;  %v50_v26 = vld [vmem:[%s1337_s1 + $0xc8] sm:$0xff]  ;;  %v65_v29 = vld [vmem:[%s1337_s1 + $0x140] sm:$0xff]  ;;  %v32_v32 = vld [vmem:[%s1337_s1 + $0x38] sm:$0xff] }
   0xb   :  { %329 = vmatpush.msra.mxu3 %v85_v15  ;;  %310 = vmatpush.msra.mxu2 %v68_v17  ;;  %v82_v27 = vld [vmem:[%s1337_s1 + $0x1c8] sm:$0xff]  ;;  %v49_v30 = vld [vmem:[%s1337_s1 + $0xc0] sm:$0xff]  ;;  %v64_v33 = vld [vmem:[%s1337_s1 + $0x138] sm:$0xff] }
   0xc   :  { %290 = vmatpush.msra.mxu1 %v52_v18  ;;  %271 = vmatpush.msra.mxu0 %v35_v20  ;;  %v81_v31 = vld [vmem:[%s1337_s1 + $0x1c0] sm:$0xff]  ;;  %v48_v34 = vld [vmem:[%s1337_s1 + $0xb8] sm:$0xff]  ;;  %v31_v36 = vld [vmem:[%s1337_s1 + $0x30] sm:$0xff] }
   0xd   :  { %330 = vmatpush.msra.mxu3 %v84_v19  ;;  %311 = vmatpush.msra.mxu2 %v67_v21  ;;  %v80_v35 = vld [vmem:[%s1337_s1 + $0x1b8] sm:$0xff]  ;;  %v63_v37 = vld [vmem:[%s1337_s1 + $0x130] sm:$0xff]  ;;  %v30_v40 = vld [vmem:[%s1337_s1 + $0x28] sm:$0xff] }
   0xe   :  { %291 = vmatpush.msra.mxu1 %v51_v22  ;;  %272 = vmatpush.msra.mxu0 %v34_v24  ;;  %v47_v38 = vld [vmem:[%s1337_s1 + $0xb0] sm:$0xff]  ;;  %v62_v41 = vld [vmem:[%s1337_s1 + $0x128] sm:$0xff]  ;;  %v29_v44 = vld [vmem:[%s1337_s1 + $0x20] sm:$0xff] }
   0xf   :  { %331 = vmatpush.msra.mxu3 %v83_v23  ;;  %312 = vmatpush.msra.mxu2 %v66_v25  ;;  %v79_v39 = vld [vmem:[%s1337_s1 + $0x1b0] sm:$0xff]  ;;  %v46_v42 = vld [vmem:[%s1337_s1 + $0xa8] sm:$0xff]  ;;  %v61_v45 = vld [vmem:[%s1337_s1 + $0x120] sm:$0xff] }
  0x10   :  { %292 = vmatpush.msra.mxu1 %v50_v26  ;;  %273 = vmatpush.msra.mxu0 %v33_v28  ;;  %v78_v43 = vld [vmem:[%s1337_s1 + $0x1a8] sm:$0xff]  ;;  %v45_v46 = vld [vmem:[%s1337_s1 + $0xa0] sm:$0xff]  ;;  %v28_v48 = vld [vmem:[%s1337_s1 + $0x18] sm:$0xff] }
  0x11   :  { %332 = vmatpush.msra.mxu3 %v82_v27  ;;  %313 = vmatpush.msra.mxu2 %v65_v29  ;;  %v77_v47 = vld [vmem:[%s1337_s1 + $0x1a0] sm:$0xff]  ;;  %v60_v49 = vld [vmem:[%s1337_s1 + $0x118] sm:$0xff]  ;;  %v27_v52 = vld [vmem:[%s1337_s1 + $0x10] sm:$0xff] }
  0x12   :  { %293 = vmatpush.msra.mxu1 %v49_v30  ;;  %274 = vmatpush.msra.mxu0 %v32_v32  ;;  %v44_v50 = vld [vmem:[%s1337_s1 + $0x98] sm:$0xff]  ;;  %v59_v53 = vld [vmem:[%s1337_s1 + $0x110] sm:$0xff]  ;;  %v26_v56 = vld [vmem:[%s1337_s1 + $0x8] sm:$0xff] }
  0x13   :  { %333 = vmatpush.msra.mxu3 %v81_v31  ;;  %314 = vmatpush.msra.mxu2 %v64_v33  ;;  %v76_v51 = vld [vmem:[%s1337_s1 + $0x198] sm:$0xff]  ;;  %v43_v54 = vld [vmem:[%s1337_s1 + $0x90] sm:$0xff]  ;;  %v58_v57 = vld [vmem:[%s1337_s1 + $0x108] sm:$0xff] }
  0x14   :  { %294 = vmatpush.msra.mxu1 %v48_v34  ;;  %275 = vmatpush.msra.mxu0 %v31_v36  ;;  %v75_v55 = vld [vmem:[%s1337_s1 + $0x190] sm:$0xff]  ;;  %v42_v58 = vld [vmem:[%s1337_s1 + $0x88] sm:$0xff]  ;;  %v25_v60 = vld [vmem:[%s1337_s1] sm:$0xff] }
  0x15   :  { %334 = vmatpush.msra.mxu3 %v80_v35  ;;  %315 = vmatpush.msra.mxu2 %v63_v37  ;;  %v74_v59 = vld [vmem:[%s1337_s1 + $0x188] sm:$0xff]  ;;  %v57_v61 = vld [vmem:[%s1337_s1 + $0x100] sm:$0xff]  ;;  %v104_v62 = vld [vmem:[%s1337_s1 + $0x278] sm:$0xff] }
  0x16   :  { %295 = vmatpush.msra.mxu1 %v47_v38  ;;  %276 = vmatpush.msra.mxu0 %v30_v40  ;;  %v136_v63 = vld [vmem:[%s1337_s1 + $0x378] sm:$0xff]  ;;  %v41_v0 = vld [vmem:[%s1337_s1 + $0x80] sm:$0xff]  ;;  %v103_v2 = vld [vmem:[%s1337_s1 + $0x270] sm:$0xff] }
  0x17   :  { %335 = vmatpush.msra.mxu3 %v79_v39  ;;  %316 = vmatpush.msra.mxu2 %v62_v41  ;;  %v73_v1 = vld [vmem:[%s1337_s1 + $0x180] sm:$0xff]  ;;  %v120_v3 = vld [vmem:[%s1337_s1 + $0x2f8] sm:$0xff]  ;;  %v135_v4 = vld [vmem:[%s1337_s1 + $0x370] sm:$0xff] }
  0x18   :  { %296 = vmatpush.msra.mxu1 %v46_v42  ;;  %277 = vmatpush.msra.mxu0 %v29_v44  ;;  %v152_v5 = vld [vmem:[%s1337_s1 + $0x3f8] sm:$0xff]  ;;  %v102_v6 = vld [vmem:[%s1337_s1 + $0x268] sm:$0xff]  ;;  %v119_v7 = vld [vmem:[%s1337_s1 + $0x2f0] sm:$0xff] }
  0x19   :  { %336 = vmatpush.msra.mxu3 %v78_v43  ;;  %317 = vmatpush.msra.mxu2 %v61_v45  ;;  %v134_v8 = vld [vmem:[%s1337_s1 + $0x368] sm:$0xff]  ;;  %v151_v9 = vld [vmem:[%s1337_s1 + $0x3f0] sm:$0xff]  ;;  %v101_v10 = vld [vmem:[%s1337_s1 + $0x260] sm:$0xff] }
  0x1a   :  { %297 = vmatpush.msra.mxu1 %v45_v46  ;;  %278 = vmatpush.msra.mxu0 %v28_v48  ;;  %v118_v11 = vld [vmem:[%s1337_s1 + $0x2e8] sm:$0xff]  ;;  %v133_v12 = vld [vmem:[%s1337_s1 + $0x360] sm:$0xff]  ;;  %v100_v14 = vld [vmem:[%s1337_s1 + $0x258] sm:$0xff] }
  0x1b   :  { %337 = vmatpush.msra.mxu3 %v77_v47  ;;  %318 = vmatpush.msra.mxu2 %v60_v49  ;;  %v150_v13 = vld [vmem:[%s1337_s1 + $0x3e8] sm:$0xff]  ;;  %v117_v15 = vld [vmem:[%s1337_s1 + $0x2e0] sm:$0xff]  ;;  %v132_v16 = vld [vmem:[%s1337_s1 + $0x358] sm:$0xff] }
  0x1c   :  { %298 = vmatpush.msra.mxu1 %v44_v50  ;;  %279 = vmatpush.msra.mxu0 %v27_v52  ;;  %v149_v17 = vld [vmem:[%s1337_s1 + $0x3e0] sm:$0xff]  ;;  %v99_v18 = vld [vmem:[%s1337_s1 + $0x250] sm:$0xff]  ;;  %v116_v19 = vld [vmem:[%s1337_s1 + $0x2d8] sm:$0xff] }
  0x1d   :  { %338 = vmatpush.msra.mxu3 %v76_v51  ;;  %319 = vmatpush.msra.mxu2 %v59_v53  ;;  %v131_v20 = vld [vmem:[%s1337_s1 + $0x350] sm:$0xff]  ;;  %v148_v21 = vld [vmem:[%s1337_s1 + $0x3d8] sm:$0xff]  ;;  %v21_v22 = vld [vmem:[%s1336_s0] sm:$0xff] }
  0x1e   :  { %299 = vmatpush.msra.mxu1 %v43_v54  ;;  %280 = vmatpush.msra.mxu0 %v26_v56  ;;  %v98_v23 = vld [vmem:[%s1337_s1 + $0x248] sm:$0xff]  ;;  %v115_v24 = vld [vmem:[%s1337_s1 + $0x2d0] sm:$0xff]  ;;  %233 = vst [vmem:[#allocation1] ss:$4 sm:$0xff] %v21_v22  ;;  %v97_v27 = vld [vmem:[%s1337_s1 + $0x240] sm:$0xff] }
  0x1f   :  { %339 = vmatpush.msra.mxu3 %v75_v55  ;;  %320 = vmatpush.msra.mxu2 %v58_v57  ;;  %v130_v25 = vld [vmem:[%s1337_s1 + $0x348] sm:$0xff]  ;;  %v147_v26 = vld [vmem:[%s1337_s1 + $0x3d0] sm:$0xff]  ;;  %v129_v29 = vld [vmem:[%s1337_s1 + $0x340] sm:$0xff] }
  0x20   :  { %300 = vmatpush.msra.mxu1 %v42_v58  ;;  %281 = vmatpush.msra.mxu0 %v25_v60  ;;  %v114_v28 = vld [vmem:[%s1337_s1 + $0x2c8] sm:$0xff]  ;;  %v96_v31 = vld [vmem:[%s1337_s1 + $0x238] sm:$0xff]  ;;  %v113_v32 = vld [vmem:[%s1337_s1 + $0x2c0] sm:$0xff] }
  0x21   :  { %340 = vmatpush.msra.mxu3 %v74_v59  ;;  %321 = vmatpush.msra.mxu2 %v57_v61  ;;  %v146_v30 = vld [vmem:[%s1337_s1 + $0x3c8] sm:$0xff]  ;;  %v128_v33 = vld [vmem:[%s1337_s1 + $0x338] sm:$0xff]  ;;  %v145_v34 = vld [vmem:[%s1337_s1 + $0x3c0] sm:$0xff] }
  0x22   :  { %346 = vmatpush.msrb.mxu0 %v104_v62  ;;  %301 = vmatpush.msra.mxu1 %v41_v0  ;;  %v95_v35 = vld [vmem:[%s1337_s1 + $0x230] sm:$0xff]  ;;  %v112_v36 = vld [vmem:[%s1337_s1 + $0x2b8] sm:$0xff]  ;;  %v22_v39 = vld [vmem:[%s1336_s0 + $0x8] sm:$0xff] }
  0x23   :  { %386 = vmatpush.msrb.mxu2 %v136_v63  ;;  %341 = vmatpush.msra.mxu3 %v73_v1  ;;  %v127_v37 = vld [vmem:[%s1337_s1 + $0x330] sm:$0xff]  ;;  %v144_v38 = vld [vmem:[%s1337_s1 + $0x3b8] sm:$0xff]  ;;  %v94_v40 = vld [vmem:[%s1337_s1 + $0x228] sm:$0xff]  ;;  %235 = vst [vmem:[#allocation1 + $0x20] ss:$4 sm:$0xff] %v22_v39 }
  0x24   :  { %347 = vmatpush.msrb.mxu0 %v103_v2  ;;  %366 = vmatpush.msrb.mxu1 %v120_v3  ;;  %v111_v41 = vld [vmem:[%s1337_s1 + $0x2b0] sm:$0xff]  ;;  %v126_v43 = vld [vmem:[%s1337_s1 + $0x328] sm:$0xff]  ;;  %v93_v49 = vld [vmem:[%s1337_s1 + $0x220] sm:$0xff] }
  0x25   :  { %387 = vmatpush.msrb.mxu2 %v135_v4  ;;  %406 = vmatpush.msrb.mxu3 %v152_v5  ;;  %v23_v42 = vld [vmem:[%s1336_s0 + $0x10] sm:$0xff]  ;;  %v970_v45 = vld.sshfl [vmem:[#allocation1] sm:$0xff pattern:$0x73625140]  ;;  %v110_v50 = vld [vmem:[%s1337_s1 + $0x2a8] sm:$0xff] }
  0x26   :  { %348 = vmatpush.msrb.mxu0 %v102_v6  ;;  %367 = vmatpush.msrb.mxu1 %v119_v7  ;;  %v238_v44 = vld.sshfl [vmem:[#allocation1 + $0x10] sm:$0xff pattern:$0x73625140]  ;;  %v972_v46 = vld.sshfl [vmem:[#allocation1 + $0x18] sm:$0xff pattern:$0x73625140] }
  0x27   :  { %388 = vmatpush.msrb.mxu2 %v134_v8  ;;  %407 = vmatpush.msrb.mxu3 %v151_v9  ;;  %v974_v47 = vld.sshfl [vmem:[#allocation1 + $0x8] sm:$0xff pattern:$0x73625140]  ;;  %v143_v48 = vld [vmem:[%s1337_s1 + $0x3b0] sm:$0xff]  ;;  %v125_v51 = vld [vmem:[%s1337_s1 + $0x320] sm:$0xff] }
  0x28   :  { %349 = vmatpush.msrb.mxu0 %v101_v10  ;;  %368 = vmatpush.msrb.mxu1 %v118_v11  ;;  %244 = vst [vmem:[#allocation1] ss:$4 sm:$0xff] %v23_v42  ;;  %v142_v52 = vld [vmem:[%s1337_s1 + $0x3a8] sm:$0xff]  ;;  %v92_v53 = vld [vmem:[%s1337_s1 + $0x218] sm:$0xff]  ;;  %v109_v54 = vld [vmem:[%s1337_s1 + $0x2a0] sm:$0xff] }
  0x29   :  { %389 = vmatpush.msrb.mxu2 %v133_v12  ;;  %408 = vmatpush.msrb.mxu3 %v150_v13  ;;  %v124_v55 = vld [vmem:[%s1337_s1 + $0x318] sm:$0xff]  ;;  %v141_v56 = vld [vmem:[%s1337_s1 + $0x3a0] sm:$0xff]  ;;  %v91_v57 = vld [vmem:[%s1337_s1 + $0x210] sm:$0xff] }
  0x2a   :  { %350 = vmatpush.msrb.mxu0 %v100_v14  ;;  %369 = vmatpush.msrb.mxu1 %v117_v15  ;;  %v108_v58 = vld [vmem:[%s1337_s1 + $0x298] sm:$0xff]  ;;  %v1012_v60 = vld.sshfl [vmem:[#allocation1 + $0x30] sm:$0xff pattern:$0x73625140]  ;;  %v90_v2 = vld [vmem:[%s1337_s1 + $0x208] sm:$0xff] }
  0x2b   :  { %390 = vmatpush.msrb.mxu2 %v132_v16  ;;  %409 = vmatpush.msrb.mxu3 %v149_v17  ;;  %v24_v59 = vld [vmem:[%s1336_s0 + $0x18] sm:$0x3]  ;;  %v1014_v61 = vld.sshfl [vmem:[#allocation1 + $0x20] sm:$0xff pattern:$0x73625140]  ;;  %v123_v0 = vld [vmem:[%s1337_s1 + $0x310] sm:$0xff] }
  0x2c   :  { %351 = vmatpush.msrb.mxu0 %v99_v18  ;;  %370 = vmatpush.msrb.mxu1 %v116_v19  ;;  %v1016_v62 = vld.sshfl [vmem:[#allocation1 + $0x38] sm:$0xff pattern:$0x73625140]  ;;  %v1018_v63 = vld.sshfl [vmem:[#allocation1 + $0x28] sm:$0xff pattern:$0x73625140] }
  0x2d   :  { %391 = vmatpush.msrb.mxu2 %v131_v20  ;;  %410 = vmatpush.msrb.mxu3 %v148_v21  ;;  %v140_v1 = vld [vmem:[%s1337_s1 + $0x398] sm:$0xff]  ;;  %245 = vst [vmem:[#allocation1 + $0x20] ss:$4 sm:$0xff] %v24_v59  ;;  %v107_v3 = vld [vmem:[%s1337_s1 + $0x290] sm:$0xff]  ;;  %v122_v4 = vld [vmem:[%s1337_s1 + $0x308] sm:$0xff] }
  0x2e   :  { %352 = vmatpush.msrb.mxu0 %v98_v23  ;;  %371 = vmatpush.msrb.mxu1 %v115_v24  ;;  %v139_v5 = vld [vmem:[%s1337_s1 + $0x390] sm:$0xff]  ;;  %v89_v6 = vld [vmem:[%s1337_s1 + $0x200] sm:$0xff]  ;;  %v106_v7 = vld [vmem:[%s1337_s1 + $0x288] sm:$0xff] }
  0x2f   :  { %392 = vmatpush.msrb.mxu2 %v130_v25  ;;  %411 = vmatpush.msrb.mxu3 %v147_v26  ;;  %v121_v8 = vld [vmem:[%s1337_s1 + $0x300] sm:$0xff]  ;;  %v138_v9 = vld [vmem:[%s1337_s1 + $0x388] sm:$0xff]  ;;  %v168_v10 = vld [vmem:[%s1337_s1 + $0x478] sm:$0xff] }
  0x30   :  { %353 = vmatpush.msrb.mxu0 %v97_v27  ;;  %372 = vmatpush.msrb.mxu1 %v114_v28  ;;  %v200_v11 = vld [vmem:[%s1337_s1 + $0x578] sm:$0xff]  ;;  %v105_v12 = vld [vmem:[%s1337_s1 + $0x280] sm:$0xff]  ;;  %v167_v14 = vld [vmem:[%s1337_s1 + $0x470] sm:$0xff] }
  0x31   :  { %393 = vmatpush.msrb.mxu2 %v129_v29  ;;  %412 = vmatpush.msrb.mxu3 %v146_v30  ;;  %v137_v13 = vld [vmem:[%s1337_s1 + $0x380] sm:$0xff]  ;;  %v184_v15 = vld [vmem:[%s1337_s1 + $0x4f8] sm:$0xff]  ;;  %v199_v16 = vld [vmem:[%s1337_s1 + $0x570] sm:$0xff] }
  0x32   :  { %354 = vmatpush.msrb.mxu0 %v96_v31  ;;  %373 = vmatpush.msrb.mxu1 %v113_v32  ;;  %v216_v17 = vld [vmem:[%s1337_s1 + $0x5f8] sm:$0xff]  ;;  %v166_v18 = vld [vmem:[%s1337_s1 + $0x468] sm:$0xff]  ;;  %v183_v19 = vld [vmem:[%s1337_s1 + $0x4f0] sm:$0xff] }
  0x33   :  { %394 = vmatpush.msrb.mxu2 %v128_v33  ;;  %413 = vmatpush.msrb.mxu3 %v145_v34  ;;  %v198_v20 = vld [vmem:[%s1337_s1 + $0x568] sm:$0xff]  ;;  %v215_v21 = vld [vmem:[%s1337_s1 + $0x5f0] sm:$0xff]  ;;  %v165_v22 = vld [vmem:[%s1337_s1 + $0x460] sm:$0xff] }
  0x34   :  { %355 = vmatpush.msrb.mxu0 %v95_v35  ;;  %374 = vmatpush.msrb.mxu1 %v112_v36  ;;  %v182_v23 = vld [vmem:[%s1337_s1 + $0x4e8] sm:$0xff]  ;;  %v197_v24 = vld [vmem:[%s1337_s1 + $0x560] sm:$0xff]  ;;  %v164_v26 = vld [vmem:[%s1337_s1 + $0x458] sm:$0xff] }
  0x35   :  { %395 = vmatpush.msrb.mxu2 %v127_v37  ;;  %414 = vmatpush.msrb.mxu3 %v144_v38  ;;  %v214_v25 = vld [vmem:[%s1337_s1 + $0x5e8] sm:$0xff] }
  0x36   :  { %356 = vmatpush.msrb.mxu0 %v94_v40  ;;  %375 = vmatpush.msrb.mxu1 %v111_v41 }
  0x37   :  { %396 = vmatpush.msrb.mxu2 %v126_v43  ;;  %415 = vmatpush.msrb.mxu3 %v143_v48 }
  0x38   :  { %357 = vmatpush.msrb.mxu0 %v93_v49  ;;  %376 = vmatpush.msrb.mxu1 %v110_v50 }
  0x39   :  { %397 = vmatpush.msrb.mxu2 %v125_v51  ;;  %416 = vmatpush.msrb.mxu3 %v142_v52 }
  0x3a   :  { %358 = vmatpush.msrb.mxu0 %v92_v53  ;;  %377 = vmatpush.msrb.mxu1 %v109_v54 }
  0x3b   :  { %398 = vmatpush.msrb.mxu2 %v124_v55  ;;  %417 = vmatpush.msrb.mxu3 %v141_v56 }
  0x3c   :  { %359 = vmatpush.msrb.mxu0 %v91_v57  ;;  %378 = vmatpush.msrb.mxu1 %v108_v58 }
  0x3d   :  { %399 = vmatpush.msrb.mxu2 %v123_v0  ;;  %418 = vmatpush.msrb.mxu3 %v140_v1 }
  0x3e   :  { %360 = vmatpush.msrb.mxu0 %v90_v2  ;;  %379 = vmatpush.msrb.mxu1 %v107_v3 }
  0x3f   :  { %400 = vmatpush.msrb.mxu2 %v122_v4  ;;  %419 = vmatpush.msrb.mxu3 %v139_v5 }
  0x40   :  { %322 = vmatmul.f32.vlgmr.msra.gmra.mxu2 %v238_v44  ;;  %361 = vmatpush.msrb.mxu0 %v89_v6 }
  0x41   :  { %380 = vmatpush.msrb.mxu1 %v106_v7  ;;  %401 = vmatpush.msrb.mxu2 %v121_v8 }
  0x42   :  { %420 = vmatpush.msrb.mxu3 %v138_v9  ;;  %282 = vmatmul.f32.vlgmr.msra.gmra.mxu0 %v970_v45 }
  0x43   :  { %342 = vmatmul.f32.vlgmr.msra.gmra.mxu3 %v972_v46  ;;  %426 = vmatpush.msra.mxu0 %v168_v10 }
  0x44   :  { %466 = vmatpush.msra.mxu2 %v200_v11  ;;  %381 = vmatpush.msrb.mxu1 %v105_v12 }
  0x45   :  { %421 = vmatpush.msrb.mxu3 %v137_v13  ;;  %302 = vmatmul.f32.vlgmr.msra.gmra.mxu1 %v974_v47 }
  0x46   :  { %427 = vmatpush.msra.mxu0 %v167_v14  ;;  %446 = vmatpush.msra.mxu1 %v184_v15 }
  0x47   :  { %467 = vmatpush.msra.mxu2 %v199_v16  ;;  %486 = vmatpush.msra.mxu3 %v216_v17 }
  0x48   :  { %428 = vmatpush.msra.mxu0 %v166_v18  ;;  %447 = vmatpush.msra.mxu1 %v183_v19 }
  0x49   :  { %468 = vmatpush.msra.mxu2 %v198_v20  ;;  %487 = vmatpush.msra.mxu3 %v215_v21 }
  0x4a   :  { %402 = vmatmul.f32.vlgmr.msrb.gmra.mxu2 %v1012_v60  ;;  %429 = vmatpush.msra.mxu0 %v165_v22 }
  0x4b   :  { %10 = vsyncpa [#allocation3], 0  ;;  %448 = vmatpush.msra.mxu1 %v182_v23  ;;  %469 = vmatpush.msra.mxu2 %v197_v24  ;;  %v181_v27 = vld [vmem:[%s1337_s1 + $0x4e0] sm:$0xff]  ;;  %v196_v28 = vld [vmem:[%s1337_s1 + $0x558] sm:$0xff]  ;;  %vm263_vm0 = vcmask 523264   ;;  %s615_s25 = smov [#allocation2]  }
  0x4c   :  { %488 = vmatpush.msra.mxu3 %v214_v25  ;;  %362 = vmatmul.f32.vlgmr.msrb.gmra.mxu0 %v1014_v61  ;;  %v213_v29 = vld [vmem:[%s1337_s1 + $0x5e0] sm:$0xff]  ;;  %v163_v30 = vld [vmem:[%s1337_s1 + $0x450] sm:$0xff]  ;;  %v180_v31 = vld [vmem:[%s1337_s1 + $0x4d8] sm:$0xff]  ;;  %s574_s26 = sshll.u32 %s615_s25, 4  ;;  %s576_s29 = sshll.u32 %s1341_s5, 4  ;;  %vm567_vm1 = vcmask 74752   ;;  %s575_s26 = int_to_ptr.vmem [resolvable:$true] %s574_s26  ;;  %s577_s29 = int_to_ptr.hbm [resolvable:$true] %s576_s29 }
  0x4d   :  { %422 = vmatmul.f32.vlgmr.msrb.gmra.mxu3 %v1016_v62  ;;  %430 = vmatpush.msra.mxu0 %v164_v26  ;;  %v195_v32 = vld [vmem:[%s1337_s1 + $0x550] sm:$0xff]  ;;  %v212_v33 = vld [vmem:[%s1337_s1 + $0x5d8] sm:$0xff]  ;;  %v162_v34 = vld [vmem:[%s1337_s1 + $0x448] sm:$0xff] }
  0x4e   :  { %449 = vmatpush.msra.mxu1 %v181_v27  ;;  %470 = vmatpush.msra.mxu2 %v196_v28  ;;  %v179_v35 = vld [vmem:[%s1337_s1 + $0x4d0] sm:$0xff]  ;;  %v194_v36 = vld [vmem:[%s1337_s1 + $0x548] sm:$0xff]  ;;  %v161_v38 = vld [vmem:[%s1337_s1 + $0x440] sm:$0xff] }
  0x4f   :  { %489 = vmatpush.msra.mxu3 %v213_v29  ;;  %382 = vmatmul.f32.vlgmr.msrb.gmra.mxu1 %v1018_v63  ;;  %v211_v37 = vld [vmem:[%s1337_s1 + $0x5d0] sm:$0xff]  ;;  %v178_v39 = vld [vmem:[%s1337_s1 + $0x4c8] sm:$0xff]  ;;  %v193_v40 = vld [vmem:[%s1337_s1 + $0x540] sm:$0xff] }
  0x50   :  { %431 = vmatpush.msra.mxu0 %v163_v30  ;;  %450 = vmatpush.msra.mxu1 %v180_v31  ;;  %v210_v41 = vld [vmem:[%s1337_s1 + $0x5c8] sm:$0xff]  ;;  %v160_v42 = vld [vmem:[%s1337_s1 + $0x438] sm:$0xff]  ;;  %v177_v43 = vld [vmem:[%s1337_s1 + $0x4c0] sm:$0xff] }
  0x51   :  { %471 = vmatpush.msra.mxu2 %v195_v32  ;;  %490 = vmatpush.msra.mxu3 %v212_v33  ;;  %v192_v44 = vld [vmem:[%s1337_s1 + $0x538] sm:$0xff]  ;;  %v209_v45 = vld [vmem:[%s1337_s1 + $0x5c0] sm:$0xff]  ;;  %v159_v46 = vld [vmem:[%s1337_s1 + $0x430] sm:$0xff] }
  0x52   :  { %432 = vmatpush.msra.mxu0 %v162_v34  ;;  %451 = vmatpush.msra.mxu1 %v179_v35  ;;  %v176_v47 = vld [vmem:[%s1337_s1 + $0x4b8] sm:$0xff]  ;;  %v191_v48 = vld [vmem:[%s1337_s1 + $0x530] sm:$0xff]  ;;  %v158_v50 = vld [vmem:[%s1337_s1 + $0x428] sm:$0xff] }
  0x53   :  { %472 = vmatpush.msra.mxu2 %v194_v36  ;;  %491 = vmatpush.msra.mxu3 %v211_v37  ;;  %v208_v49 = vld [vmem:[%s1337_s1 + $0x5b8] sm:$0xff]  ;;  %v175_v51 = vld [vmem:[%s1337_s1 + $0x4b0] sm:$0xff]  ;;  %v190_v52 = vld [vmem:[%s1337_s1 + $0x528] sm:$0xff] }
  0x54   :  { %433 = vmatpush.msra.mxu0 %v161_v38  ;;  %452 = vmatpush.msra.mxu1 %v178_v39  ;;  %v207_v53 = vld [vmem:[%s1337_s1 + $0x5b0] sm:$0xff]  ;;  %v157_v54 = vld [vmem:[%s1337_s1 + $0x420] sm:$0xff]  ;;  %v174_v55 = vld [vmem:[%s1337_s1 + $0x4a8] sm:$0xff] }
  0x55   :  { %473 = vmatpush.msra.mxu2 %v193_v40  ;;  %492 = vmatpush.msra.mxu3 %v210_v41  ;;  %v189_v56 = vld [vmem:[%s1337_s1 + $0x520] sm:$0xff]  ;;  %v206_v57 = vld [vmem:[%s1337_s1 + $0x5a8] sm:$0xff]  ;;  %v156_v58 = vld [vmem:[%s1337_s1 + $0x418] sm:$0xff] }
  0x56   :  { %434 = vmatpush.msra.mxu0 %v160_v42  ;;  %453 = vmatpush.msra.mxu1 %v177_v43  ;;  %v173_v59 = vld [vmem:[%s1337_s1 + $0x4a0] sm:$0xff]  ;;  %v188_v60 = vld [vmem:[%s1337_s1 + $0x518] sm:$0xff]  ;;  %v155_v62 = vld [vmem:[%s1337_s1 + $0x410] sm:$0xff] }
  0x57   :  { %474 = vmatpush.msra.mxu2 %v192_v44  ;;  %493 = vmatpush.msra.mxu3 %v209_v45  ;;  %v205_v61 = vld [vmem:[%s1337_s1 + $0x5a0] sm:$0xff]  ;;  %v172_v63 = vld [vmem:[%s1337_s1 + $0x498] sm:$0xff]  ;;  %v187_v0 = vld [vmem:[%s1337_s1 + $0x510] sm:$0xff] }
  0x58   :  { %435 = vmatpush.msra.mxu0 %v159_v46  ;;  %454 = vmatpush.msra.mxu1 %v176_v47  ;;  %v204_v1 = vld [vmem:[%s1337_s1 + $0x598] sm:$0xff]  ;;  %v154_v2 = vld [vmem:[%s1337_s1 + $0x408] sm:$0xff]  ;;  %v171_v3 = vld [vmem:[%s1337_s1 + $0x490] sm:$0xff] }
  0x59   :  { %475 = vmatpush.msra.mxu2 %v191_v48  ;;  %494 = vmatpush.msra.mxu3 %v208_v49  ;;  %v186_v4 = vld [vmem:[%s1337_s1 + $0x508] sm:$0xff]  ;;  %v203_v5 = vld [vmem:[%s1337_s1 + $0x590] sm:$0xff]  ;;  %v153_v6 = vld [vmem:[%s1337_s1 + $0x400] sm:$0xff] }
  0x5a   :  { %436 = vmatpush.msra.mxu0 %v158_v50  ;;  %455 = vmatpush.msra.mxu1 %v175_v51  ;;  %v170_v7 = vld [vmem:[%s1337_s1 + $0x488] sm:$0xff]  ;;  %v185_v8 = vld [vmem:[%s1337_s1 + $0x500] sm:$0xff]  ;;  %v248_v11 = vld.sshfl [vmem:[#allocation1 + $0x10] sm:$0xff pattern:$0x73625140] }
  0x5b   :  { %476 = vmatpush.msra.mxu2 %v190_v52  ;;  %495 = vmatpush.msra.mxu3 %v207_v53  ;;  %v202_v9 = vld [vmem:[%s1337_s1 + $0x588] sm:$0xff]  ;;  %v246_v10 = vld.sshfl [vmem:[#allocation1] sm:$0xff pattern:$0x73625140]  ;;  %v224_v12 = vld [vmem:[%s1337_s1 + $0x638] sm:$0xff] }
  0x5c   :  { %437 = vmatpush.msra.mxu0 %v157_v54  ;;  %456 = vmatpush.msra.mxu1 %v174_v55  ;;  %v169_v13 = vld [vmem:[%s1337_s1 + $0x480] sm:$0xff]  ;;  %v247_v15 = vld.sshfl [vmem:[#allocation1 + $0x8] sm:$0xff pattern:$0x73625140]  ;;  %v223_v17 = vld [vmem:[%s1337_s1 + $0x630] sm:$0xff] }
  0x5d   :  { %477 = vmatpush.msra.mxu2 %v189_v56  ;;  %496 = vmatpush.msra.mxu3 %v206_v57  ;;  %v201_v14 = vld [vmem:[%s1337_s1 + $0x580] sm:$0xff]  ;;  %v249_v16 = vld.sshfl [vmem:[#allocation1 + $0x18] sm:$0xff pattern:$0x73625140]  ;;  %v222_v18 = vld [vmem:[%s1337_s1 + $0x628] sm:$0xff] }
  0x5e   :  { %438 = vmatpush.msra.mxu0 %v156_v58  ;;  %457 = vmatpush.msra.mxu1 %v173_v59  ;;  %v221_v19 = vld [vmem:[%s1337_s1 + $0x620] sm:$0xff]  ;;  %v220_v20 = vld [vmem:[%s1337_s1 + $0x618] sm:$0xff]  ;;  %v219_v21 = vld [vmem:[%s1337_s1 + $0x610] sm:$0xff] }
  0x5f   :  { %478 = vmatpush.msra.mxu2 %v188_v60  ;;  %497 = vmatpush.msra.mxu3 %v205_v61  ;;  %v218_v22 = vld [vmem:[%s1337_s1 + $0x608] sm:$0xff]  ;;  %v217_v23 = vld [vmem:[%s1337_s1 + $0x600] sm:$0xff]  ;;  %v542_v25 = vld [vmem:[%s1339_s3 + $0x78] sm:$0xff] }
  0x60   :  { %439 = vmatpush.msra.mxu0 %v155_v62  ;;  %458 = vmatpush.msra.mxu1 %v172_v63  ;;  %v250_v24 = vld.sshfl [vmem:[#allocation1 + $0x20] sm:$0xff pattern:$0x73625140]  ;;  %v541_v26 = vld [vmem:[%s1339_s3 + $0x70] sm:$0xff]  ;;  %v540_v27 = vld [vmem:[%s1339_s3 + $0x68] sm:$0xff] }
  0x61   :  { %479 = vmatpush.msra.mxu2 %v187_v0  ;;  %498 = vmatpush.msra.mxu3 %v204_v1  ;;  %v539_v28 = vld [vmem:[%s1339_s3 + $0x60] sm:$0xff]  ;;  %v538_v29 = vld [vmem:[%s1339_s3 + $0x58] sm:$0xff]  ;;  %v537_v30 = vld [vmem:[%s1339_s3 + $0x50] sm:$0xff] }
  0x62   :  { %440 = vmatpush.msra.mxu0 %v154_v2  ;;  %459 = vmatpush.msra.mxu1 %v171_v3  ;;  %v536_v31 = vld [vmem:[%s1339_s3 + $0x48] sm:$0xff]  ;;  %v587_v32 = vld [vmem:[%s1338_s2] ss:$0 sm:$0xff]  ;;  %v534_v34 = vld [vmem:[%s1339_s3 + $0x38] sm:$0xff] }
  0x63   :  { %480 = vmatpush.msra.mxu2 %v186_v4  ;;  %499 = vmatpush.msra.mxu3 %v203_v5  ;;  %v535_v33 = vld [vmem:[%s1339_s3 + $0x40] sm:$0xff]  ;;  %v533_v37 = vld [vmem:[%s1339_s3 + $0x30] sm:$0xff]  ;;  %v532_v39 = vld [vmem:[%s1339_s3 + $0x28] sm:$0xff] }
  0x64   :  { %441 = vmatpush.msra.mxu0 %v153_v6  ;;  %460 = vmatpush.msra.mxu1 %v170_v7  ;;  %v531_v40 = vld [vmem:[%s1339_s3 + $0x20] sm:$0xff]  ;;  %v530_v42 = vld [vmem:[%s1339_s3 + $0x18] sm:$0xff]  ;;  %v529_v45 = vld [vmem:[%s1339_s3 + $0x10] sm:$0xff] }
  0x65   :  { %481 = vmatpush.msra.mxu2 %v185_v8  ;;  %500 = vmatpush.msra.mxu3 %v202_v9  ;;  %v528_v47 = vld [vmem:[%s1339_s3 + $0x8] sm:$0xff]  ;;  %v527_v49 = vld [vmem:[%s1339_s3] sm:$0xff] }
  0x66   :  { %442 = vmatmul.f32.vlgmr.msra.gmra.mxu0 %v246_v10  ;;  %482 = vmatmul.f32.vlgmr.msra.gmra.mxu2 %v248_v11  ;;  %v588_v5 = vld [vmem:[%s1340_s4] ss:$0 sm:$0xff] }
  0x67   :  { %514 = vmatpush.msrb.mxu0 %v224_v12  ;;  %461 = vmatpush.msra.mxu1 %v169_v13 }
  0x68   :  { %501 = vmatpush.msra.mxu3 %v201_v14  ;;  %462 = vmatmul.f32.vlgmr.msra.gmra.mxu1 %v247_v15 }
  0x69   :  { %502 = vmatmul.f32.vlgmr.msra.gmra.mxu3 %v249_v16  ;;  %515 = vmatpush.msrb.mxu0 %v223_v17 }
  0x6a   :  { %547 = vmatpush.msrb.mxu1 %v542_v25 }
  0x6b   :  { %516 = vmatpush.msrb.mxu0 %v222_v18 }
  0x6c   :  { %548 = vmatpush.msrb.mxu1 %v541_v26 }
  0x6d   :  { %517 = vmatpush.msrb.mxu0 %v221_v19 }
  0x6e   :  { %549 = vmatpush.msrb.mxu1 %v540_v27 }
  0x6f   :  { %518 = vmatpush.msrb.mxu0 %v220_v20 }
  0x70   :  { %550 = vmatpush.msrb.mxu1 %v539_v28 }
  0x71   :  { %519 = vmatpush.msrb.mxu0 %v219_v21 }
  0x72   :  { %551 = vmatpush.msrb.mxu1 %v538_v29 }
  0x73   :  { %520 = vmatpush.msrb.mxu0 %v218_v22 }
  0x74   :  { %552 = vmatpush.msrb.mxu1 %v537_v30 }
  0x75   :  { %521 = vmatpush.msrb.mxu0 %v217_v23 }
  0x76   :  { %585 = vmatmul.msk.f32.vlgmr.msrb.gmra.mxu0 %vm263_vm0, %v250_v24  ;;  %553 = vmatpush.msrb.mxu1 %v536_v31 }
  0x78   :  { %554 = vmatpush.msrb.mxu1 %v535_v33 }
  0x7a   :  { %555 = vmatpush.msrb.mxu1 %v534_v34 }
  0x7c   :  { %556 = vmatpush.msrb.mxu1 %v533_v37 }
  0x7e   :  { %557 = vmatpush.msrb.mxu1 %v532_v39 }
  0x80   :  { %558 = vmatpush.msrb.mxu1 %v531_v40 }
  0x82   :  { %559 = vmatpush.msrb.mxu1 %v530_v42 }
  0x84   :  { %560 = vmatpush.msrb.mxu1 %v529_v45 }
  0x86   :  { %561 = vmatpush.msrb.mxu1 %v528_v47 }
  0x88   :  { %562 = vmatpush.msrb.mxu1 %v527_v49 }
  0xbf   :  { %v283_v35 = vpop.f32.mrf.mxu0 }
  0xc0   :  { %v284_v36 = vadd.f32 %v587_v32, %v283_v35 }
  0xc2   :  { %v303_v38 = vpop.f32.mrf.mxu1 }
  0xc3   :  { %v304_v41 = vadd.f32 %v303_v38, %v284_v36  ;;  %v323_v43 = vpop.f32.mrf.mxu2 }
  0xc5   :  { %v324_v44 = vadd.f32 %v323_v43, %v304_v41 }
  0xc6   :  { %v343_v46 = vpop.f32.mrf.mxu3 }
  0xc7   :  { %v344_v48 = vadd.f32 %v343_v46, %v324_v44 }
  0xc9   :  { %v363_v50 = vpop.f32.mrf.mxu0 }
  0xca   :  { %v364_v51 = vadd.f32 %v363_v50, %v344_v48 }
  0xcc   :  { %v383_v52 = vpop.f32.mrf.mxu1 }
  0xcd   :  { %v384_v53 = vadd.f32 %v383_v52, %v364_v51  ;;  %v403_v54 = vpop.f32.mrf.mxu2 }
  0xcf   :  { %v404_v55 = vadd.f32 %v403_v54, %v384_v53 }
  0xd0   :  { %v423_v56 = vpop.f32.mrf.mxu3 }
  0xd1   :  { %v424_v58 = vadd.f32 %v423_v56, %v404_v55 }
  0xe3   :  { %v443_v57 = vpop.f32.mrf.mxu0 }
  0xe4   :  { %v444_v59 = vadd.f32 %v443_v57, %v424_v58 }
  0xe5   :  { %v463_v60 = vpop.f32.mrf.mxu1 }
  0xe6   :  { %v464_v62 = vadd.f32 %v463_v60, %v444_v59 }
  0xe9   :  { %v483_v61 = vpop.f32.mrf.mxu2 }
  0xea   :  { %v484_v63 = vadd.f32 %v483_v61, %v464_v62 }
  0xec   :  { %v503_v0 = vpop.f32.mrf.mxu3 }
  0xed   :  { %v504_v1 = vadd.f32 %v503_v0, %v484_v63 }
  0xf3   :  { %v523_v2 = vpop.f32.mrf.mxu0 }
  0xf4   :  { %v524_v3 = vadd.f32 %v523_v2, %v504_v1 }
  0xf6   :  { %v526_v4 = vmax.f32 %v524_v3, 0.0 }
  0xf8   :  { %563 = vmatmul.f32.vlgmr.msrb.gmra.mxu1 %v526_v4 }
 0x175   :  { %v564_v6 = vpop.f32.mrf.mxu1 }
 0x176   :  { %v565_v7 = vadd.f32 %v588_v5, %v564_v6 }
 0x178   :  { %568 = vst.msk [vmem:[#allocation2] sm:$0x3] %vm567_vm1, %v565_v7 }
 0x179   :  { %579 = dma.vmem_to_hbm [thread:$0]  %s575_s26, 32, %s577_s29, [#allocation3]  }
 0x17a   :  { %613 = dma.done.wait [#allocation3], 32  }
 0x17b   :  { %614 = vsyncadd [#allocation3], 4294967264 }
 0x17c   :  { %584 = vsyncpa [#allocation3], 1 }

</bundles_post_ra>
